<compile_context>
chip_gen: v7x
topology: tpu7x:2x2x1
jax: 0.10.0
libtpu: 0.0.40
codegen_flags: <defaults>
</compile_context>

<pallas_src>
import functools

import jax
import jax.numpy as jnp
from jax import lax
from jax.experimental import pallas as pl
from jax.experimental.pallas import tpu as pltpu


def _round_up(n, m):
    return ((n + m - 1) // m) * m


# ---------------------------------------------------------------------------
# Fused bidirectional-LSTM + Linear kernel (single invocation, no grid)
# ---------------------------------------------------------------------------
def _bilstm_kernel(x_ref, wih_ref, b_ref, whhf_ref, whhb_ref, wemb_ref,
                   bemb_ref, out_ref, gx_scr, h2_scr, *, T, Bp, H):
    """
    x_ref    : (T*Bp, nIn)     time-major, batch padded to Bp (multiple of 8)
    wih_ref  : (nIn, 8H)       [W_ih_fwd | W_ih_bwd], gate order i,f,g,o
    b_ref    : (1, 8H)         combined b_ih + b_hh, same layout
    whhf_ref : (H, 4H)         forward  recurrent weights
    whhb_ref : (H, 4H)         backward recurrent weights
    wemb_ref : (2H, nOut_pad)  embedding weights (transposed, lane-padded)
    bemb_ref : (1, nOut_pad)
    out_ref  : (T*Bp, nOut_pad)
    gx_scr   : (T*Bp, 8H)      hoisted input projection (both directions)
    h2_scr   : (T*Bp, 2H)      [h_fwd | h_bwd] per (t, b) row
    """
    GH = 4 * H

    # --- 1) input projection for every timestep & both directions:
    #        one MXU-efficient matmul (M = T*Bp) instead of 2*T tiny ones.
    gx_scr[...] = (
        jnp.dot(x_ref[...], wih_ref[...], preferred_element_type=jnp.float32)
        + b_ref[...]
    )

    # Hoist recurrent-weight loads out of the unrolled loop.
    whh_f = whhf_ref[...]
    whh_b = whhb_ref[...]

    def cell(gx, h, c, whh):
        # gx already contains x @ W_ih + (b_ih + b_hh)
        gates = gx + jnp.dot(h, whh, preferred_element_type=jnp.float32)
        # Activations on the full (Bp, 4H) vreg (EUP); slice afterwards.
        sig = jax.nn.sigmoid(gates)
        tnh = jnp.tanh(gates)
        i_g = sig[:, 0 * H:1 * H]
        f_g = sig[:, 1 * H:2 * H]
        g_g = tnh[:, 2 * H:3 * H]
        o_g = sig[:, 3 * H:4 * H]
        c_new = f_g * c + i_g * g_g
        h_new = o_g * jnp.tanh(c_new)
        return h_new, c_new

    zeros = jnp.zeros((Bp, H), jnp.float32)
    h_f, c_f = zeros, zeros
    h_b, c_b = zeros, zeros

    # --- 2) recurrence: fully unrolled (static T); forward step s and
    #        backward step T-1-s share an iteration (directions fused on one
    #        TensorCore -- only h @ W_hh is on the serial critical path).
    for s in range(T):
        rf = s * Bp             # row block of forward timestep s
        rb = (T - 1 - s) * Bp   # row block of backward timestep T-1-s
        h_f, c_f = cell(gx_scr[rf:rf + Bp, 0:GH], h_f, c_f, whh_f)
        h_b, c_b = cell(gx_scr[rb:rb + Bp, GH:2 * GH], h_b, c_b, whh_b)
        h2_scr[rf:rf + Bp, 0:H] = h_f
        h2_scr[rb:rb + Bp, H:2 * H] = h_b

    # --- 3) fused embedding: one big matmul, lane-dense store (nOut padded
    #        to a multiple of 128 in the wrapper).
    out_ref[...] = (
        jnp.dot(h2_scr[...], wemb_ref[...], preferred_element_type=jnp.float32)
        + bemb_ref[...]
    )


# ---------------------------------------------------------------------------
# Wrapper (pure-JAX layout plumbing only)
# ---------------------------------------------------------------------------
def bilstm_forward(x, params):
    T, B, nIn = x.shape
    H = params["whh_f"].shape[0]
    nOut = params["w_emb"].shape[1]

    Bp = _round_up(B, 8)            # f32 sublane-full batch
    nOut_p = _round_up(nOut, 128)   # lane-dense output

    # Pad batch (LSTM rows are independent -> padded rows are discarded).
    x_p = jnp.pad(x.astype(jnp.float32), ((0, 0), (0, Bp - B), (0, 0)))
    x_flat = x_p.reshape(T * Bp, nIn)

    # [fwd | bwd] packed input-projection weights / bias.
    wih_cat = jnp.concatenate([params["wih_f"], params["wih_b"]], axis=1)
    b_cat = jnp.concatenate([params["b_f"], params["b_b"]], axis=1)

    # Lane-pad the embedding to 128 columns (sliced off below).
    w_emb_p = jnp.pad(params["w_emb"], ((0, 0), (0, nOut_p - nOut)))
    b_emb_p = jnp.pad(params["b_emb"], ((0, 0), (0, nOut_p - nOut)))

    kernel = functools.partial(_bilstm_kernel, T=T, Bp=Bp, H=H)
    vmem = pl.BlockSpec(memory_space=pltpu.MemorySpace.VMEM)

    out_flat = pl.pallas_call(
        kernel,
        out_shape=jax.ShapeDtypeStruct((T * Bp, nOut_p), jnp.float32),
        in_specs=[vmem] * 7,
        out_specs=vmem,
        scratch_shapes=[
            pltpu.VMEM((T * Bp, 8 * H), jnp.float32),   # hoisted gates
            pltpu.VMEM((T * Bp, 2 * H), jnp.float32),   # [h_fwd | h_bwd]
        ],
    )(x_flat, wih_cat, b_cat, params["whh_f"], params["whh_b"],
      w_emb_p, b_emb_p)

    return out_flat.reshape(T, Bp, nOut_p)[:, :B, :nOut]


# ---------------------------------------------------------------------------
# Pure-JAX reference (for correctness check)
# ---------------------------------------------------------------------------
def _ref_direction(x, wih_t, whh_t, bias, H):
    def step(carry, xt):
        h, c = carry
        gates = jnp.dot(xt, wih_t) + jnp.dot(h, whh_t) + bias
        i = jax.nn.sigmoid(gates[:, 0 * H:1 * H])
        f = jax.nn.sigmoid(gates[:, 1 * H:2 * H])
        g = jnp.tanh(gates[:, 2 * H:3 * H])
        o = jax.nn.sigmoid(gates[:, 3 * H:4 * H])
        c = f * c + i * g
        h = o * jnp.tanh(c)
        return (h, c), h

    B = x.shape[1]
    init = (jnp.zeros((B, H), jnp.float32), jnp.zeros((B, H), jnp.float32))
    _, hs = lax.scan(step, init, x)
    return hs


def bilstm_reference(x, params, H):
    T, B, _ = x.shape
    h_fwd = _ref_direction(x, params["wih_f"], params["whh_f"],
                           params["b_f"], H)
    h_bwd = _ref_direction(x[::-1], params["wih_b"], params["whh_b"],
                           params["b_b"], H)[::-1]
    rnn_out = jnp.concatenate([h_fwd, h_bwd], axis=-1).reshape(T * B, -1)
    out = jnp.dot(rnn_out, params["w_emb"]) + params["b_emb"]
    return out.reshape(T, B, -1)


# ---------------------------------------------------------------------------
# Main
# ---------------------------------------------------------------------------
if __name__ == "__main__":
    # Small shapes consistent with the module:
    #   nIn=16, nHidden=32, nOut=10, seq T=8, batch B=2
    T, B, nIn, H, nOut = 8, 2, 16, 32, 10

    key = jax.random.PRNGKey(0)
    ks = jax.random.split(key, 11)
    scale = 1.0 / jnp.sqrt(H)

    def u(k, shape):
        return jax.random.uniform(k, shape, jnp.float32, -scale, scale)

    # Parameters (PyTorch nn.LSTM stores weight_ih as (4H, nIn); pre-transposed
    # here; gate order i, f, g, o; bias = b_ih + b_hh).
    params = {
        "wih_f": u(ks[0], (nIn, 4 * H)),
        "whh_f": u(ks[1], (H, 4 * H)),
        "b_f":   (u(ks[2], (1, 4 * H)) + u(ks[3], (1, 4 * H))),
        "wih_b": u(ks[4], (nIn, 4 * H)),
        "whh_b": u(ks[5], (H, 4 * H)),
        "b_b":   (u(ks[6], (1, 4 * H)) + u(ks[7], (1, 4 * H))),
        "w_emb": u(ks[8], (2 * H, nOut)),   # Linear weight (nOut, 2H) transposed
        "b_emb": u(ks[9], (1, nOut)),
    }

    x = jax.random.normal(ks[10], (T, B, nIn), jnp.float32)

    out = jax.block_until_ready(jax.jit(bilstm_forward)(x, params))
    ref = jax.block_until_ready(bilstm_reference(x, params, H))

    assert out.shape == (T, B, nOut), out.shape
    err = float(jnp.max(jnp.abs(out - ref)))
    # Default (native-MXU) matmul precision is used in the kernel, so allow a
    # looser tolerance than bit-exact f32; structural bugs would be O(0.1+).
    assert err < 5e-2, err

    print("KERNEL_OK")
</pallas_src>

<mosaic_0001>
module attributes {stable_mosaic.version = 11 : i64} {
  func.func @_bilstm_kernel(%arg0: memref<64x16xf32, #tpu.memory_space<vmem>>, %arg1: memref<16x256xf32, #tpu.memory_space<vmem>>, %arg2: memref<1x256xf32, #tpu.memory_space<vmem>>, %arg3: memref<32x128xf32, #tpu.memory_space<vmem>>, %arg4: memref<32x128xf32, #tpu.memory_space<vmem>>, %arg5: memref<64x128xf32, #tpu.memory_space<vmem>>, %arg6: memref<1x128xf32, #tpu.memory_space<vmem>>, %arg7: memref<64x128xf32, #tpu.memory_space<vmem>>, %arg8: memref<64x256xf32, #tpu.memory_space<vmem>>, %arg9: memref<64x64xf32, #tpu.memory_space<vmem>>) attributes {dimension_semantics = [], scalar_prefetch = 0 : i64, scratch_operands = 2 : i64, tpu.core_type = #tpu.core_type<tc>} {
    %c0 = arith.constant 0 : index
    %c0_0 = arith.constant 0 : index
    %0 = vector.load %arg0[%c0, %c0_0] : memref<64x16xf32, #tpu.memory_space<vmem>>, vector<64x16xf32>
    %c0_1 = arith.constant 0 : index
    %c0_2 = arith.constant 0 : index
    %1 = vector.load %arg1[%c0_1, %c0_2] : memref<16x256xf32, #tpu.memory_space<vmem>>, vector<16x256xf32>
    %cst = arith.constant dense<0.000000e+00> : vector<64x256xf32>
    %2 = tpu.matmul %0, %1, %cst {dimension_numbers = #tpu.dot_dimension_numbers<[1], [0], [0], [1], [0, 0, 1, 1], [], []>} : vector<64x16xf32>, vector<16x256xf32>, vector<64x256xf32> -> vector<64x256xf32>
    %c0_3 = arith.constant 0 : index
    %c0_4 = arith.constant 0 : index
    %3 = vector.load %arg2[%c0_3, %c0_4] : memref<1x256xf32, #tpu.memory_space<vmem>>, vector<1x256xf32>
    %4 = vector.broadcast %3 : vector<1x256xf32> to vector<64x256xf32>
    %5 = arith.addf %2, %4 : vector<64x256xf32>
    %c0_5 = arith.constant 0 : index
    %c0_6 = arith.constant 0 : index
    %6 = vector.load %arg8[%c0_5, %c0_6] : memref<64x256xf32, #tpu.memory_space<vmem>>, vector<64x256xf32>
    tpu.vector_store %arg8[%c0_5, %c0_6], %5 {strides = array<i32>} : memref<64x256xf32, #tpu.memory_space<vmem>>, vector<64x256xf32>,
    %c0_7 = arith.constant 0 : index
    %c0_8 = arith.constant 0 : index
    %7 = vector.load %arg3[%c0_7, %c0_8] : memref<32x128xf32, #tpu.memory_space<vmem>>, vector<32x128xf32>
    %c0_9 = arith.constant 0 : index
    %c0_10 = arith.constant 0 : index
    %8 = vector.load %arg4[%c0_9, %c0_10] : memref<32x128xf32, #tpu.memory_space<vmem>>, vector<32x128xf32>
    %cst_11 = arith.constant 0.000000e+00 : f32
    %9 = vector.broadcast %cst_11 : f32 to vector<8x32xf32>
    %c0_12 = arith.constant 0 : index
    %c0_13 = arith.constant 0 : index
    %10 = vector.load %arg8[%c0_12, %c0_13] : memref<64x256xf32, #tpu.memory_space<vmem>>, vector<8x128xf32>
    %cst_14 = arith.constant dense<0.000000e+00> : vector<8x128xf32>
    %11 = tpu.matmul %9, %7, %cst_14 {dimension_numbers = #tpu.dot_dimension_numbers<[1], [0], [0], [1], [0, 0, 1, 1], [], []>} : vector<8x32xf32>, vector<32x128xf32>, vector<8x128xf32> -> vector<8x128xf32>
    %12 = arith.addf %10, %11 : vector<8x128xf32>
    %13 = arith.negf %12 : vector<8x128xf32>
    %14 = math.exp %13 : vector<8x128xf32>
    %cst_15 = arith.constant 1.000000e+00 : f32
    %15 = vector.broadcast %cst_15 : f32 to vector<8x128xf32>
    %16 = arith.addf %15, %14 : vector<8x128xf32>
    %17 = arith.divf %15, %16 : vector<8x128xf32>
    %18 = math.tanh %12 : vector<8x128xf32>
    %19 = vector.extract_strided_slice %17 {offsets = [0, 0], sizes = [8, 32], strides = [1, 1]} : vector<8x128xf32> to vector<8x32xf32>
    %20 = vector.extract_strided_slice %17 {offsets = [0, 32], sizes = [8, 32], strides = [1, 1]} : vector<8x128xf32> to vector<8x32xf32>
    %21 = vector.extract_strided_slice %18 {offsets = [0, 64], sizes = [8, 32], strides = [1, 1]} : vector<8x128xf32> to vector<8x32xf32>
    %22 = vector.extract_strided_slice %17 {offsets = [0, 96], sizes = [8, 32], strides = [1, 1]} : vector<8x128xf32> to vector<8x32xf32>
    %23 = arith.mulf %20, %9 : vector<8x32xf32>
    %24 = arith.mulf %19, %21 : vector<8x32xf32>
    %25 = arith.addf %23, %24 : vector<8x32xf32>
    %26 = math.tanh %25 : vector<8x32xf32>
    %27 = arith.mulf %22, %26 : vector<8x32xf32>
    %c56 = arith.constant 56 : index
    %c128 = arith.constant 128 : index
    %28 = vector.load %arg8[%c56, %c128] : memref<64x256xf32, #tpu.memory_space<vmem>>, vector<8x128xf32>
    %cst_16 = arith.constant dense<0.000000e+00> : vector<8x128xf32>
    %29 = tpu.matmul %9, %8, %cst_16 {dimension_numbers = #tpu.dot_dimension_numbers<[1], [0], [0], [1], [0, 0, 1, 1], [], []>} : vector<8x32xf32>, vector<32x128xf32>, vector<8x128xf32> -> vector<8x128xf32>
    %30 = arith.addf %28, %29 : vector<8x128xf32>
    %31 = arith.negf %30 : vector<8x128xf32>
    %32 = math.exp %31 : vector<8x128xf32>
    %cst_17 = arith.constant 1.000000e+00 : f32
    %33 = vector.broadcast %cst_17 : f32 to vector<8x128xf32>
    %34 = arith.addf %33, %32 : vector<8x128xf32>
    %35 = arith.divf %33, %34 : vector<8x128xf32>
    %36 = math.tanh %30 : vector<8x128xf32>
    %37 = vector.extract_strided_slice %35 {offsets = [0, 0], sizes = [8, 32], strides = [1, 1]} : vector<8x128xf32> to vector<8x32xf32>
    %38 = vector.extract_strided_slice %35 {offsets = [0, 32], sizes = [8, 32], strides = [1, 1]} : vector<8x128xf32> to vector<8x32xf32>
    %39 = vector.extract_strided_slice %36 {offsets = [0, 64], sizes = [8, 32], strides = [1, 1]} : vector<8x128xf32> to vector<8x32xf32>
    %40 = vector.extract_strided_slice %35 {offsets = [0, 96], sizes = [8, 32], strides = [1, 1]} : vector<8x128xf32> to vector<8x32xf32>
    %41 = arith.mulf %38, %9 : vector<8x32xf32>
    %42 = arith.mulf %37, %39 : vector<8x32xf32>
    %43 = arith.addf %41, %42 : vector<8x32xf32>
    %44 = math.tanh %43 : vector<8x32xf32>
    %45 = arith.mulf %40, %44 : vector<8x32xf32>
    %c0_18 = arith.constant 0 : index
    %c0_19 = arith.constant 0 : index
    %46 = vector.load %arg9[%c0_18, %c0_19] : memref<64x64xf32, #tpu.memory_space<vmem>>, vector<8x32xf32>
    tpu.vector_store %arg9[%c0_18, %c0_19], %27 {strides = array<i32>} : memref<64x64xf32, #tpu.memory_space<vmem>>, vector<8x32xf32>,
    %c56_20 = arith.constant 56 : index
    %c32 = arith.constant 32 : index
    %47 = vector.load %arg9[%c56_20, %c32] : memref<64x64xf32, #tpu.memory_space<vmem>>, vector<8x32xf32>
    tpu.vector_store %arg9[%c56_20, %c32], %45 {strides = array<i32>} : memref<64x64xf32, #tpu.memory_space<vmem>>, vector<8x32xf32>,
    %c8 = arith.constant 8 : index
    %c0_21 = arith.constant 0 : index
    %48 = vector.load %arg8[%c8, %c0_21] : memref<64x256xf32, #tpu.memory_space<vmem>>, vector<8x128xf32>
    %cst_22 = arith.constant dense<0.000000e+00> : vector<8x128xf32>
    %49 = tpu.matmul %27, %7, %cst_22 {dimension_numbers = #tpu.dot_dimension_numbers<[1], [0], [0], [1], [0, 0, 1, 1], [], []>} : vector<8x32xf32>, vector<32x128xf32>, vector<8x128xf32> -> vector<8x128xf32>
    %50 = arith.addf %48, %49 : vector<8x128xf32>
    %51 = arith.negf %50 : vector<8x128xf32>
    %52 = math.exp %51 : vector<8x128xf32>
    %cst_23 = arith.constant 1.000000e+00 : f32
    %53 = vector.broadcast %cst_23 : f32 to vector<8x128xf32>
    %54 = arith.addf %53, %52 : vector<8x128xf32>
    %55 = arith.divf %53, %54 : vector<8x128xf32>
    %56 = math.tanh %50 : vector<8x128xf32>
    %57 = vector.extract_strided_slice %55 {offsets = [0, 0], sizes = [8, 32], strides = [1, 1]} : vector<8x128xf32> to vector<8x32xf32>
    %58 = vector.extract_strided_slice %55 {offsets = [0, 32], sizes = [8, 32], strides = [1, 1]} : vector<8x128xf32> to vector<8x32xf32>
    %59 = vector.extract_strided_slice %56 {offsets = [0, 64], sizes = [8, 32], strides = [1, 1]} : vector<8x128xf32> to vector<8x32xf32>
    %60 = vector.extract_strided_slice %55 {offsets = [0, 96], sizes = [8, 32], strides = [1, 1]} : vector<8x128xf32> to vector<8x32xf32>
    %61 = arith.mulf %58, %25 : vector<8x32xf32>
    %62 = arith.mulf %57, %59 : vector<8x32xf32>
    %63 = arith.addf %61, %62 : vector<8x32xf32>
    %64 = math.tanh %63 : vector<8x32xf32>
    %65 = arith.mulf %60, %64 : vector<8x32xf32>
    %c48 = arith.constant 48 : index
    %c128_24 = arith.constant 128 : index
    %66 = vector.load %arg8[%c48, %c128_24] : memref<64x256xf32, #tpu.memory_space<vmem>>, vector<8x128xf32>
    %cst_25 = arith.constant dense<0.000000e+00> : vector<8x128xf32>
    %67 = tpu.matmul %45, %8, %cst_25 {dimension_numbers = #tpu.dot_dimension_numbers<[1], [0], [0], [1], [0, 0, 1, 1], [], []>} : vector<8x32xf32>, vector<32x128xf32>, vector<8x128xf32> -> vector<8x128xf32>
    %68 = arith.addf %66, %67 : vector<8x128xf32>
    %69 = arith.negf %68 : vector<8x128xf32>
    %70 = math.exp %69 : vector<8x128xf32>
    %cst_26 = arith.constant 1.000000e+00 : f32
    %71 = vector.broadcast %cst_26 : f32 to vector<8x128xf32>
    %72 = arith.addf %71, %70 : vector<8x128xf32>
    %73 = arith.divf %71, %72 : vector<8x128xf32>
    %74 = math.tanh %68 : vector<8x128xf32>
    %75 = vector.extract_strided_slice %73 {offsets = [0, 0], sizes = [8, 32], strides = [1, 1]} : vector<8x128xf32> to vector<8x32xf32>
    %76 = vector.extract_strided_slice %73 {offsets = [0, 32], sizes = [8, 32], strides = [1, 1]} : vector<8x128xf32> to vector<8x32xf32>
    %77 = vector.extract_strided_slice %74 {offsets = [0, 64], sizes = [8, 32], strides = [1, 1]} : vector<8x128xf32> to vector<8x32xf32>
    %78 = vector.extract_strided_slice %73 {offsets = [0, 96], sizes = [8, 32], strides = [1, 1]} : vector<8x128xf32> to vector<8x32xf32>
    %79 = arith.mulf %76, %43 : vector<8x32xf32>
    %80 = arith.mulf %75, %77 : vector<8x32xf32>
    %81 = arith.addf %79, %80 : vector<8x32xf32>
    %82 = math.tanh %81 : vector<8x32xf32>
    %83 = arith.mulf %78, %82 : vector<8x32xf32>
    %c8_27 = arith.constant 8 : index
    %c0_28 = arith.constant 0 : index
    %84 = vector.load %arg9[%c8_27, %c0_28] : memref<64x64xf32, #tpu.memory_space<vmem>>, vector<8x32xf32>
    tpu.vector_store %arg9[%c8_27, %c0_28], %65 {strides = array<i32>} : memref<64x64xf32, #tpu.memory_space<vmem>>, vector<8x32xf32>,
    %c48_29 = arith.constant 48 : index
    %c32_30 = arith.constant 32 : index
    %85 = vector.load %arg9[%c48_29, %c32_30] : memref<64x64xf32, #tpu.memory_space<vmem>>, vector<8x32xf32>
    tpu.vector_store %arg9[%c48_29, %c32_30], %83 {strides = array<i32>} : memref<64x64xf32, #tpu.memory_space<vmem>>, vector<8x32xf32>,
    %c16 = arith.constant 16 : index
    %c0_31 = arith.constant 0 : index
    %86 = vector.load %arg8[%c16, %c0_31] : memref<64x256xf32, #tpu.memory_space<vmem>>, vector<8x128xf32>
    %cst_32 = arith.constant dense<0.000000e+00> : vector<8x128xf32>
    %87 = tpu.matmul %65, %7, %cst_32 {dimension_numbers = #tpu.dot_dimension_numbers<[1], [0], [0], [1], [0, 0, 1, 1], [], []>} : vector<8x32xf32>, vector<32x128xf32>, vector<8x128xf32> -> vector<8x128xf32>
    %88 = arith.addf %86, %87 : vector<8x128xf32>
    %89 = arith.negf %88 : vector<8x128xf32>
    %90 = math.exp %89 : vector<8x128xf32>
    %cst_33 = arith.constant 1.000000e+00 : f32
    %91 = vector.broadcast %cst_33 : f32 to vector<8x128xf32>
    %92 = arith.addf %91, %90 : vector<8x128xf32>
    %93 = arith.divf %91, %92 : vector<8x128xf32>
    %94 = math.tanh %88 : vector<8x128xf32>
    %95 = vector.extract_strided_slice %93 {offsets = [0, 0], sizes = [8, 32], strides = [1, 1]} : vector<8x128xf32> to vector<8x32xf32>
    %96 = vector.extract_strided_slice %93 {offsets = [0, 32], sizes = [8, 32], strides = [1, 1]} : vector<8x128xf32> to vector<8x32xf32>
    %97 = vector.extract_strided_slice %94 {offsets = [0, 64], sizes = [8, 32], strides = [1, 1]} : vector<8x128xf32> to vector<8x32xf32>
    %98 = vector.extract_strided_slice %93 {offsets = [0, 96], sizes = [8, 32], strides = [1, 1]} : vector<8x128xf32> to vector<8x32xf32>
    %99 = arith.mulf %96, %63 : vector<8x32xf32>
    %100 = arith.mulf %95, %97 : vector<8x32xf32>
    %101 = arith.addf %99, %100 : vector<8x32xf32>
    %102 = math.tanh %101 : vector<8x32xf32>
    %103 = arith.mulf %98, %102 : vector<8x32xf32>
    %c40 = arith.constant 40 : index
    %c128_34 = arith.constant 128 : index
    %104 = vector.load %arg8[%c40, %c128_34] : memref<64x256xf32, #tpu.memory_space<vmem>>, vector<8x128xf32>
    %cst_35 = arith.constant dense<0.000000e+00> : vector<8x128xf32>
    %105 = tpu.matmul %83, %8, %cst_35 {dimension_numbers = #tpu.dot_dimension_numbers<[1], [0], [0], [1], [0, 0, 1, 1], [], []>} : vector<8x32xf32>, vector<32x128xf32>, vector<8x128xf32> -> vector<8x128xf32>
    %106 = arith.addf %104, %105 : vector<8x128xf32>
    %107 = arith.negf %106 : vector<8x128xf32>
    %108 = math.exp %107 : vector<8x128xf32>
    %cst_36 = arith.constant 1.000000e+00 : f32
    %109 = vector.broadcast %cst_36 : f32 to vector<8x128xf32>
    %110 = arith.addf %109, %108 : vector<8x128xf32>
    %111 = arith.divf %109, %110 : vector<8x128xf32>
    %112 = math.tanh %106 : vector<8x128xf32>
    %113 = vector.extract_strided_slice %111 {offsets = [0, 0], sizes = [8, 32], strides = [1, 1]} : vector<8x128xf32> to vector<8x32xf32>
    %114 = vector.extract_strided_slice %111 {offsets = [0, 32], sizes = [8, 32], strides = [1, 1]} : vector<8x128xf32> to vector<8x32xf32>
    %115 = vector.extract_strided_slice %112 {offsets = [0, 64], sizes = [8, 32], strides = [1, 1]} : vector<8x128xf32> to vector<8x32xf32>
    %116 = vector.extract_strided_slice %111 {offsets = [0, 96], sizes = [8, 32], strides = [1, 1]} : vector<8x128xf32> to vector<8x32xf32>
    %117 = arith.mulf %114, %81 : vector<8x32xf32>
    %118 = arith.mulf %113, %115 : vector<8x32xf32>
    %119 = arith.addf %117, %118 : vector<8x32xf32>
    %120 = math.tanh %119 : vector<8x32xf32>
    %121 = arith.mulf %116, %120 : vector<8x32xf32>
    %c16_37 = arith.constant 16 : index
    %c0_38 = arith.constant 0 : index
    %122 = vector.load %arg9[%c16_37, %c0_38] : memref<64x64xf32, #tpu.memory_space<vmem>>, vector<8x32xf32>
    tpu.vector_store %arg9[%c16_37, %c0_38], %103 {strides = array<i32>} : memref<64x64xf32, #tpu.memory_space<vmem>>, vector<8x32xf32>,
    %c40_39 = arith.constant 40 : index
    %c32_40 = arith.constant 32 : index
    %123 = vector.load %arg9[%c40_39, %c32_40] : memref<64x64xf32, #tpu.memory_space<vmem>>, vector<8x32xf32>
    tpu.vector_store %arg9[%c40_39, %c32_40], %121 {strides = array<i32>} : memref<64x64xf32, #tpu.memory_space<vmem>>, vector<8x32xf32>,
    %c24 = arith.constant 24 : index
    %c0_41 = arith.constant 0 : index
    %124 = vector.load %arg8[%c24, %c0_41] : memref<64x256xf32, #tpu.memory_space<vmem>>, vector<8x128xf32>
    %cst_42 = arith.constant dense<0.000000e+00> : vector<8x128xf32>
    %125 = tpu.matmul %103, %7, %cst_42 {dimension_numbers = #tpu.dot_dimension_numbers<[1], [0], [0], [1], [0, 0, 1, 1], [], []>} : vector<8x32xf32>, vector<32x128xf32>, vector<8x128xf32> -> vector<8x128xf32>
    %126 = arith.addf %124, %125 : vector<8x128xf32>
    %127 = arith.negf %126 : vector<8x128xf32>
    %128 = math.exp %127 : vector<8x128xf32>
    %cst_43 = arith.constant 1.000000e+00 : f32
    %129 = vector.broadcast %cst_43 : f32 to vector<8x128xf32>
    %130 = arith.addf %129, %128 : vector<8x128xf32>
    %131 = arith.divf %129, %130 : vector<8x128xf32>
    %132 = math.tanh %126 : vector<8x128xf32>
    %133 = vector.extract_strided_slice %131 {offsets = [0, 0], sizes = [8, 32], strides = [1, 1]} : vector<8x128xf32> to vector<8x32xf32>
    %134 = vector.extract_strided_slice %131 {offsets = [0, 32], sizes = [8, 32], strides = [1, 1]} : vector<8x128xf32> to vector<8x32xf32>
    %135 = vector.extract_strided_slice %132 {offsets = [0, 64], sizes = [8, 32], strides = [1, 1]} : vector<8x128xf32> to vector<8x32xf32>
    %136 = vector.extract_strided_slice %131 {offsets = [0, 96], sizes = [8, 32], strides = [1, 1]} : vector<8x128xf32> to vector<8x32xf32>
    %137 = arith.mulf %134, %101 : vector<8x32xf32>
    %138 = arith.mulf %133, %135 : vector<8x32xf32>
    %139 = arith.addf %137, %138 : vector<8x32xf32>
    %140 = math.tanh %139 : vector<8x32xf32>
    %141 = arith.mulf %136, %140 : vector<8x32xf32>
    %c32_44 = arith.constant 32 : index
    %c128_45 = arith.constant 128 : index
    %142 = vector.load %arg8[%c32_44, %c128_45] : memref<64x256xf32, #tpu.memory_space<vmem>>, vector<8x128xf32>
    %cst_46 = arith.constant dense<0.000000e+00> : vector<8x128xf32>
    %143 = tpu.matmul %121, %8, %cst_46 {dimension_numbers = #tpu.dot_dimension_numbers<[1], [0], [0], [1], [0, 0, 1, 1], [], []>} : vector<8x32xf32>, vector<32x128xf32>, vector<8x128xf32> -> vector<8x128xf32>
    %144 = arith.addf %142, %143 : vector<8x128xf32>
    %145 = arith.negf %144 : vector<8x128xf32>
    %146 = math.exp %145 : vector<8x128xf32>
    %cst_47 = arith.constant 1.000000e+00 : f32
    %147 = vector.broadcast %cst_47 : f32 to vector<8x128xf32>
    %148 = arith.addf %147, %146 : vector<8x128xf32>
    %149 = arith.divf %147, %148 : vector<8x128xf32>
    %150 = math.tanh %144 : vector<8x128xf32>
    %151 = vector.extract_strided_slice %149 {offsets = [0, 0], sizes = [8, 32], strides = [1, 1]} : vector<8x128xf32> to vector<8x32xf32>
    %152 = vector.extract_strided_slice %149 {offsets = [0, 32], sizes = [8, 32], strides = [1, 1]} : vector<8x128xf32> to vector<8x32xf32>
    %153 = vector.extract_strided_slice %150 {offsets = [0, 64], sizes = [8, 32], strides = [1, 1]} : vector<8x128xf32> to vector<8x32xf32>
    %154 = vector.extract_strided_slice %149 {offsets = [0, 96], sizes = [8, 32], strides = [1, 1]} : vector<8x128xf32> to vector<8x32xf32>
    %155 = arith.mulf %152, %119 : vector<8x32xf32>
    %156 = arith.mulf %151, %153 : vector<8x32xf32>
    %157 = arith.addf %155, %156 : vector<8x32xf32>
    %158 = math.tanh %157 : vector<8x32xf32>
    %159 = arith.mulf %154, %158 : vector<8x32xf32>
    %c24_48 = arith.constant 24 : index
    %c0_49 = arith.constant 0 : index
    %160 = vector.load %arg9[%c24_48, %c0_49] : memref<64x64xf32, #tpu.memory_space<vmem>>, vector<8x32xf32>
    tpu.vector_store %arg9[%c24_48, %c0_49], %141 {strides = array<i32>} : memref<64x64xf32, #tpu.memory_space<vmem>>, vector<8x32xf32>,
    %c32_50 = arith.constant 32 : index
    %c32_51 = arith.constant 32 : index
    %161 = vector.load %arg9[%c32_50, %c32_51] : memref<64x64xf32, #tpu.memory_space<vmem>>, vector<8x32xf32>
    tpu.vector_store %arg9[%c32_50, %c32_51], %159 {strides = array<i32>} : memref<64x64xf32, #tpu.memory_space<vmem>>, vector<8x32xf32>,
    %c32_52 = arith.constant 32 : index
    %c0_53 = arith.constant 0 : index
    %162 = vector.load %arg8[%c32_52, %c0_53] : memref<64x256xf32, #tpu.memory_space<vmem>>, vector<8x128xf32>
    %cst_54 = arith.constant dense<0.000000e+00> : vector<8x128xf32>
    %163 = tpu.matmul %141, %7, %cst_54 {dimension_numbers = #tpu.dot_dimension_numbers<[1], [0], [0], [1], [0, 0, 1, 1], [], []>} : vector<8x32xf32>, vector<32x128xf32>, vector<8x128xf32> -> vector<8x128xf32>
    %164 = arith.addf %162, %163 : vector<8x128xf32>
    %165 = arith.negf %164 : vector<8x128xf32>
    %166 = math.exp %165 : vector<8x128xf32>
    %cst_55 = arith.constant 1.000000e+00 : f32
    %167 = vector.broadcast %cst_55 : f32 to vector<8x128xf32>
    %168 = arith.addf %167, %166 : vector<8x128xf32>
    %169 = arith.divf %167, %168 : vector<8x128xf32>
    %170 = math.tanh %164 : vector<8x128xf32>
    %171 = vector.extract_strided_slice %169 {offsets = [0, 0], sizes = [8, 32], strides = [1, 1]} : vector<8x128xf32> to vector<8x32xf32>
    %172 = vector.extract_strided_slice %169 {offsets = [0, 32], sizes = [8, 32], strides = [1, 1]} : vector<8x128xf32> to vector<8x32xf32>
    %173 = vector.extract_strided_slice %170 {offsets = [0, 64], sizes = [8, 32], strides = [1, 1]} : vector<8x128xf32> to vector<8x32xf32>
    %174 = vector.extract_strided_slice %169 {offsets = [0, 96], sizes = [8, 32], strides = [1, 1]} : vector<8x128xf32> to vector<8x32xf32>
    %175 = arith.mulf %172, %139 : vector<8x32xf32>
    %176 = arith.mulf %171, %173 : vector<8x32xf32>
    %177 = arith.addf %175, %176 : vector<8x32xf32>
    %178 = math.tanh %177 : vector<8x32xf32>
    %179 = arith.mulf %174, %178 : vector<8x32xf32>
    %c24_56 = arith.constant 24 : index
    %c128_57 = arith.constant 128 : index
    %180 = vector.load %arg8[%c24_56, %c128_57] : memref<64x256xf32, #tpu.memory_space<vmem>>, vector<8x128xf32>
    %cst_58 = arith.constant dense<0.000000e+00> : vector<8x128xf32>
    %181 = tpu.matmul %159, %8, %cst_58 {dimension_numbers = #tpu.dot_dimension_numbers<[1], [0], [0], [1], [0, 0, 1, 1], [], []>} : vector<8x32xf32>, vector<32x128xf32>, vector<8x128xf32> -> vector<8x128xf32>
    %182 = arith.addf %180, %181 : vector<8x128xf32>
    %183 = arith.negf %182 : vector<8x128xf32>
    %184 = math.exp %183 : vector<8x128xf32>
    %cst_59 = arith.constant 1.000000e+00 : f32
    %185 = vector.broadcast %cst_59 : f32 to vector<8x128xf32>
    %186 = arith.addf %185, %184 : vector<8x128xf32>
    %187 = arith.divf %185, %186 : vector<8x128xf32>
    %188 = math.tanh %182 : vector<8x128xf32>
    %189 = vector.extract_strided_slice %187 {offsets = [0, 0], sizes = [8, 32], strides = [1, 1]} : vector<8x128xf32> to vector<8x32xf32>
    %190 = vector.extract_strided_slice %187 {offsets = [0, 32], sizes = [8, 32], strides = [1, 1]} : vector<8x128xf32> to vector<8x32xf32>
    %191 = vector.extract_strided_slice %188 {offsets = [0, 64], sizes = [8, 32], strides = [1, 1]} : vector<8x128xf32> to vector<8x32xf32>
    %192 = vector.extract_strided_slice %187 {offsets = [0, 96], sizes = [8, 32], strides = [1, 1]} : vector<8x128xf32> to vector<8x32xf32>
    %193 = arith.mulf %190, %157 : vector<8x32xf32>
    %194 = arith.mulf %189, %191 : vector<8x32xf32>
    %195 = arith.addf %193, %194 : vector<8x32xf32>
    %196 = math.tanh %195 : vector<8x32xf32>
    %197 = arith.mulf %192, %196 : vector<8x32xf32>
    %c32_60 = arith.constant 32 : index
    %c0_61 = arith.constant 0 : index
    %198 = vector.load %arg9[%c32_60, %c0_61] : memref<64x64xf32, #tpu.memory_space<vmem>>, vector<8x32xf32>
    tpu.vector_store %arg9[%c32_60, %c0_61], %179 {strides = array<i32>} : memref<64x64xf32, #tpu.memory_space<vmem>>, vector<8x32xf32>,
    %c24_62 = arith.constant 24 : index
    %c32_63 = arith.constant 32 : index
    %199 = vector.load %arg9[%c24_62, %c32_63] : memref<64x64xf32, #tpu.memory_space<vmem>>, vector<8x32xf32>
    tpu.vector_store %arg9[%c24_62, %c32_63], %197 {strides = array<i32>} : memref<64x64xf32, #tpu.memory_space<vmem>>, vector<8x32xf32>,
    %c40_64 = arith.constant 40 : index
    %c0_65 = arith.constant 0 : index
    %200 = vector.load %arg8[%c40_64, %c0_65] : memref<64x256xf32, #tpu.memory_space<vmem>>, vector<8x128xf32>
    %cst_66 = arith.constant dense<0.000000e+00> : vector<8x128xf32>
    %201 = tpu.matmul %179, %7, %cst_66 {dimension_numbers = #tpu.dot_dimension_numbers<[1], [0], [0], [1], [0, 0, 1, 1], [], []>} : vector<8x32xf32>, vector<32x128xf32>, vector<8x128xf32> -> vector<8x128xf32>
    %202 = arith.addf %200, %201 : vector<8x128xf32>
    %203 = arith.negf %202 : vector<8x128xf32>
    %204 = math.exp %203 : vector<8x128xf32>
    %cst_67 = arith.constant 1.000000e+00 : f32
    %205 = vector.broadcast %cst_67 : f32 to vector<8x128xf32>
    %206 = arith.addf %205, %204 : vector<8x128xf32>
    %207 = arith.divf %205, %206 : vector<8x128xf32>
    %208 = math.tanh %202 : vector<8x128xf32>
    %209 = vector.extract_strided_slice %207 {offsets = [0, 0], sizes = [8, 32], strides = [1, 1]} : vector<8x128xf32> to vector<8x32xf32>
    %210 = vector.extract_strided_slice %207 {offsets = [0, 32], sizes = [8, 32], strides = [1, 1]} : vector<8x128xf32> to vector<8x32xf32>
    %211 = vector.extract_strided_slice %208 {offsets = [0, 64], sizes = [8, 32], strides = [1, 1]} : vector<8x128xf32> to vector<8x32xf32>
    %212 = vector.extract_strided_slice %207 {offsets = [0, 96], sizes = [8, 32], strides = [1, 1]} : vector<8x128xf32> to vector<8x32xf32>
    %213 = arith.mulf %210, %177 : vector<8x32xf32>
    %214 = arith.mulf %209, %211 : vector<8x32xf32>
    %215 = arith.addf %213, %214 : vector<8x32xf32>
    %216 = math.tanh %215 : vector<8x32xf32>
    %217 = arith.mulf %212, %216 : vector<8x32xf32>
    %c16_68 = arith.constant 16 : index
    %c128_69 = arith.constant 128 : index
    %218 = vector.load %arg8[%c16_68, %c128_69] : memref<64x256xf32, #tpu.memory_space<vmem>>, vector<8x128xf32>
    %cst_70 = arith.constant dense<0.000000e+00> : vector<8x128xf32>
    %219 = tpu.matmul %197, %8, %cst_70 {dimension_numbers = #tpu.dot_dimension_numbers<[1], [0], [0], [1], [0, 0, 1, 1], [], []>} : vector<8x32xf32>, vector<32x128xf32>, vector<8x128xf32> -> vector<8x128xf32>
    %220 = arith.addf %218, %219 : vector<8x128xf32>
    %221 = arith.negf %220 : vector<8x128xf32>
    %222 = math.exp %221 : vector<8x128xf32>
    %cst_71 = arith.constant 1.000000e+00 : f32
    %223 = vector.broadcast %cst_71 : f32 to vector<8x128xf32>
    %224 = arith.addf %223, %222 : vector<8x128xf32>
    %225 = arith.divf %223, %224 : vector<8x128xf32>
    %226 = math.tanh %220 : vector<8x128xf32>
    %227 = vector.extract_strided_slice %225 {offsets = [0, 0], sizes = [8, 32], strides = [1, 1]} : vector<8x128xf32> to vector<8x32xf32>
    %228 = vector.extract_strided_slice %225 {offsets = [0, 32], sizes = [8, 32], strides = [1, 1]} : vector<8x128xf32> to vector<8x32xf32>
    %229 = vector.extract_strided_slice %226 {offsets = [0, 64], sizes = [8, 32], strides = [1, 1]} : vector<8x128xf32> to vector<8x32xf32>
    %230 = vector.extract_strided_slice %225 {offsets = [0, 96], sizes = [8, 32], strides = [1, 1]} : vector<8x128xf32> to vector<8x32xf32>
    %231 = arith.mulf %228, %195 : vector<8x32xf32>
    %232 = arith.mulf %227, %229 : vector<8x32xf32>
    %233 = arith.addf %231, %232 : vector<8x32xf32>
    %234 = math.tanh %233 : vector<8x32xf32>
    %235 = arith.mulf %230, %234 : vector<8x32xf32>
    %c40_72 = arith.constant 40 : index
    %c0_73 = arith.constant 0 : index
    %236 = vector.load %arg9[%c40_72, %c0_73] : memref<64x64xf32, #tpu.memory_space<vmem>>, vector<8x32xf32>
    tpu.vector_store %arg9[%c40_72, %c0_73], %217 {strides = array<i32>} : memref<64x64xf32, #tpu.memory_space<vmem>>, vector<8x32xf32>,
    %c16_74 = arith.constant 16 : index
    %c32_75 = arith.constant 32 : index
    %237 = vector.load %arg9[%c16_74, %c32_75] : memref<64x64xf32, #tpu.memory_space<vmem>>, vector<8x32xf32>
    tpu.vector_store %arg9[%c16_74, %c32_75], %235 {strides = array<i32>} : memref<64x64xf32, #tpu.memory_space<vmem>>, vector<8x32xf32>,
    %c48_76 = arith.constant 48 : index
    %c0_77 = arith.constant 0 : index
    %238 = vector.load %arg8[%c48_76, %c0_77] : memref<64x256xf32, #tpu.memory_space<vmem>>, vector<8x128xf32>
    %cst_78 = arith.constant dense<0.000000e+00> : vector<8x128xf32>
    %239 = tpu.matmul %217, %7, %cst_78 {dimension_numbers = #tpu.dot_dimension_numbers<[1], [0], [0], [1], [0, 0, 1, 1], [], []>} : vector<8x32xf32>, vector<32x128xf32>, vector<8x128xf32> -> vector<8x128xf32>
    %240 = arith.addf %238, %239 : vector<8x128xf32>
    %241 = arith.negf %240 : vector<8x128xf32>
    %242 = math.exp %241 : vector<8x128xf32>
    %cst_79 = arith.constant 1.000000e+00 : f32
    %243 = vector.broadcast %cst_79 : f32 to vector<8x128xf32>
    %244 = arith.addf %243, %242 : vector<8x128xf32>
    %245 = arith.divf %243, %244 : vector<8x128xf32>
    %246 = math.tanh %240 : vector<8x128xf32>
    %247 = vector.extract_strided_slice %245 {offsets = [0, 0], sizes = [8, 32], strides = [1, 1]} : vector<8x128xf32> to vector<8x32xf32>
    %248 = vector.extract_strided_slice %245 {offsets = [0, 32], sizes = [8, 32], strides = [1, 1]} : vector<8x128xf32> to vector<8x32xf32>
    %249 = vector.extract_strided_slice %246 {offsets = [0, 64], sizes = [8, 32], strides = [1, 1]} : vector<8x128xf32> to vector<8x32xf32>
    %250 = vector.extract_strided_slice %245 {offsets = [0, 96], sizes = [8, 32], strides = [1, 1]} : vector<8x128xf32> to vector<8x32xf32>
    %251 = arith.mulf %248, %215 : vector<8x32xf32>
    %252 = arith.mulf %247, %249 : vector<8x32xf32>
    %253 = arith.addf %251, %252 : vector<8x32xf32>
    %254 = math.tanh %253 : vector<8x32xf32>
    %255 = arith.mulf %250, %254 : vector<8x32xf32>
    %c8_80 = arith.constant 8 : index
    %c128_81 = arith.constant 128 : index
    %256 = vector.load %arg8[%c8_80, %c128_81] : memref<64x256xf32, #tpu.memory_space<vmem>>, vector<8x128xf32>
    %cst_82 = arith.constant dense<0.000000e+00> : vector<8x128xf32>
    %257 = tpu.matmul %235, %8, %cst_82 {dimension_numbers = #tpu.dot_dimension_numbers<[1], [0], [0], [1], [0, 0, 1, 1], [], []>} : vector<8x32xf32>, vector<32x128xf32>, vector<8x128xf32> -> vector<8x128xf32>
    %258 = arith.addf %256, %257 : vector<8x128xf32>
    %259 = arith.negf %258 : vector<8x128xf32>
    %260 = math.exp %259 : vector<8x128xf32>
    %cst_83 = arith.constant 1.000000e+00 : f32
    %261 = vector.broadcast %cst_83 : f32 to vector<8x128xf32>
    %262 = arith.addf %261, %260 : vector<8x128xf32>
    %263 = arith.divf %261, %262 : vector<8x128xf32>
    %264 = math.tanh %258 : vector<8x128xf32>
    %265 = vector.extract_strided_slice %263 {offsets = [0, 0], sizes = [8, 32], strides = [1, 1]} : vector<8x128xf32> to vector<8x32xf32>
    %266 = vector.extract_strided_slice %263 {offsets = [0, 32], sizes = [8, 32], strides = [1, 1]} : vector<8x128xf32> to vector<8x32xf32>
    %267 = vector.extract_strided_slice %264 {offsets = [0, 64], sizes = [8, 32], strides = [1, 1]} : vector<8x128xf32> to vector<8x32xf32>
    %268 = vector.extract_strided_slice %263 {offsets = [0, 96], sizes = [8, 32], strides = [1, 1]} : vector<8x128xf32> to vector<8x32xf32>
    %269 = arith.mulf %266, %233 : vector<8x32xf32>
    %270 = arith.mulf %265, %267 : vector<8x32xf32>
    %271 = arith.addf %269, %270 : vector<8x32xf32>
    %272 = math.tanh %271 : vector<8x32xf32>
    %273 = arith.mulf %268, %272 : vector<8x32xf32>
    %c48_84 = arith.constant 48 : index
    %c0_85 = arith.constant 0 : index
    %274 = vector.load %arg9[%c48_84, %c0_85] : memref<64x64xf32, #tpu.memory_space<vmem>>, vector<8x32xf32>
    tpu.vector_store %arg9[%c48_84, %c0_85], %255 {strides = array<i32>} : memref<64x64xf32, #tpu.memory_space<vmem>>, vector<8x32xf32>,
    %c8_86 = arith.constant 8 : index
    %c32_87 = arith.constant 32 : index
    %275 = vector.load %arg9[%c8_86, %c32_87] : memref<64x64xf32, #tpu.memory_space<vmem>>, vector<8x32xf32>
    tpu.vector_store %arg9[%c8_86, %c32_87], %273 {strides = array<i32>} : memref<64x64xf32, #tpu.memory_space<vmem>>, vector<8x32xf32>,
    %c56_88 = arith.constant 56 : index
    %c0_89 = arith.constant 0 : index
    %276 = vector.load %arg8[%c56_88, %c0_89] : memref<64x256xf32, #tpu.memory_space<vmem>>, vector<8x128xf32>
    %cst_90 = arith.constant dense<0.000000e+00> : vector<8x128xf32>
    %277 = tpu.matmul %255, %7, %cst_90 {dimension_numbers = #tpu.dot_dimension_numbers<[1], [0], [0], [1], [0, 0, 1, 1], [], []>} : vector<8x32xf32>, vector<32x128xf32>, vector<8x128xf32> -> vector<8x128xf32>
    %278 = arith.addf %276, %277 : vector<8x128xf32>
    %279 = arith.negf %278 : vector<8x128xf32>
    %280 = math.exp %279 : vector<8x128xf32>
    %cst_91 = arith.constant 1.000000e+00 : f32
    %281 = vector.broadcast %cst_91 : f32 to vector<8x128xf32>
    %282 = arith.addf %281, %280 : vector<8x128xf32>
    %283 = arith.divf %281, %282 : vector<8x128xf32>
    %284 = math.tanh %278 : vector<8x128xf32>
    %285 = vector.extract_strided_slice %283 {offsets = [0, 0], sizes = [8, 32], strides = [1, 1]} : vector<8x128xf32> to vector<8x32xf32>
    %286 = vector.extract_strided_slice %283 {offsets = [0, 32], sizes = [8, 32], strides = [1, 1]} : vector<8x128xf32> to vector<8x32xf32>
    %287 = vector.extract_strided_slice %284 {offsets = [0, 64], sizes = [8, 32], strides = [1, 1]} : vector<8x128xf32> to vector<8x32xf32>
    %288 = vector.extract_strided_slice %283 {offsets = [0, 96], sizes = [8, 32], strides = [1, 1]} : vector<8x128xf32> to vector<8x32xf32>
    %289 = arith.mulf %286, %253 : vector<8x32xf32>
    %290 = arith.mulf %285, %287 : vector<8x32xf32>
    %291 = arith.addf %289, %290 : vector<8x32xf32>
    %292 = math.tanh %291 : vector<8x32xf32>
    %293 = arith.mulf %288, %292 : vector<8x32xf32>
    %c0_92 = arith.constant 0 : index
    %c128_93 = arith.constant 128 : index
    %294 = vector.load %arg8[%c0_92, %c128_93] : memref<64x256xf32, #tpu.memory_space<vmem>>, vector<8x128xf32>
    %cst_94 = arith.constant dense<0.000000e+00> : vector<8x128xf32>
    %295 = tpu.matmul %273, %8, %cst_94 {dimension_numbers = #tpu.dot_dimension_numbers<[1], [0], [0], [1], [0, 0, 1, 1], [], []>} : vector<8x32xf32>, vector<32x128xf32>, vector<8x128xf32> -> vector<8x128xf32>
    %296 = arith.addf %294, %295 : vector<8x128xf32>
    %297 = arith.negf %296 : vector<8x128xf32>
    %298 = math.exp %297 : vector<8x128xf32>
    %cst_95 = arith.constant 1.000000e+00 : f32
    %299 = vector.broadcast %cst_95 : f32 to vector<8x128xf32>
    %300 = arith.addf %299, %298 : vector<8x128xf32>
    %301 = arith.divf %299, %300 : vector<8x128xf32>
    %302 = math.tanh %296 : vector<8x128xf32>
    %303 = vector.extract_strided_slice %301 {offsets = [0, 0], sizes = [8, 32], strides = [1, 1]} : vector<8x128xf32> to vector<8x32xf32>
    %304 = vector.extract_strided_slice %301 {offsets = [0, 32], sizes = [8, 32], strides = [1, 1]} : vector<8x128xf32> to vector<8x32xf32>
    %305 = vector.extract_strided_slice %302 {offsets = [0, 64], sizes = [8, 32], strides = [1, 1]} : vector<8x128xf32> to vector<8x32xf32>
    %306 = vector.extract_strided_slice %301 {offsets = [0, 96], sizes = [8, 32], strides = [1, 1]} : vector<8x128xf32> to vector<8x32xf32>
    %307 = arith.mulf %304, %271 : vector<8x32xf32>
    %308 = arith.mulf %303, %305 : vector<8x32xf32>
    %309 = arith.addf %307, %308 : vector<8x32xf32>
    %310 = math.tanh %309 : vector<8x32xf32>
    %311 = arith.mulf %306, %310 : vector<8x32xf32>
    %c56_96 = arith.constant 56 : index
    %c0_97 = arith.constant 0 : index
    %312 = vector.load %arg9[%c56_96, %c0_97] : memref<64x64xf32, #tpu.memory_space<vmem>>, vector<8x32xf32>
    tpu.vector_store %arg9[%c56_96, %c0_97], %293 {strides = array<i32>} : memref<64x64xf32, #tpu.memory_space<vmem>>, vector<8x32xf32>,
    %c0_98 = arith.constant 0 : index
    %c32_99 = arith.constant 32 : index
    %313 = vector.load %arg9[%c0_98, %c32_99] : memref<64x64xf32, #tpu.memory_space<vmem>>, vector<8x32xf32>
    tpu.vector_store %arg9[%c0_98, %c32_99], %311 {strides = array<i32>} : memref<64x64xf32, #tpu.memory_space<vmem>>, vector<8x32xf32>,
    %c0_100 = arith.constant 0 : index
    %c0_101 = arith.constant 0 : index
    %314 = vector.load %arg9[%c0_100, %c0_101] : memref<64x64xf32, #tpu.memory_space<vmem>>, vector<64x64xf32>
    %c0_102 = arith.constant 0 : index
    %c0_103 = arith.constant 0 : index
    %315 = vector.load %arg5[%c0_102, %c0_103] : memref<64x128xf32, #tpu.memory_space<vmem>>, vector<64x128xf32>
    %cst_104 = arith.constant dense<0.000000e+00> : vector<64x128xf32>
    %316 = tpu.matmul %314, %315, %cst_104 {dimension_numbers = #tpu.dot_dimension_numbers<[1], [0], [0], [1], [0, 0, 1, 1], [], []>} : vector<64x64xf32>, vector<64x128xf32>, vector<64x128xf32> -> vector<64x128xf32>
    %c0_105 = arith.constant 0 : index
    %c0_106 = arith.constant 0 : index
    %317 = vector.load %arg6[%c0_105, %c0_106] : memref<1x128xf32, #tpu.memory_space<vmem>>, vector<1x128xf32>
    %318 = vector.broadcast %317 : vector<1x128xf32> to vector<64x128xf32>
    %319 = arith.addf %316, %318 : vector<64x128xf32>
    %c0_107 = arith.constant 0 : index
    %c0_108 = arith.constant 0 : index
    %320 = vector.load %arg7[%c0_107, %c0_108] : memref<64x128xf32, #tpu.memory_space<vmem>>, vector<64x128xf32>
    tpu.vector_store %arg7[%c0_107, %c0_108], %319 {strides = array<i32>} : memref<64x128xf32, #tpu.memory_space<vmem>>, vector<64x128xf32>,
    return
  }
}

</mosaic_0001>

<bundles_post_ra>
// kernel: bilstm_forward.1
= control target key start
LH: loop header
LB: loop body
LE: loop exit
PB: predicated region body
PF: predicated region fallthrough
CT: control target
= control target key end

     0   :  { %v2638_v3 = vmov 0.0   ;;  %vm50_vm0 = vcmask 130048   ;;  %v2639_v12 = vmov 0.0|0.0   ;;  %vm2640_vm1 = vmmov 0   ;;  %s2642_s9 = smov 32   ;;  %s3152_s1 = inlined_call_operand.vmem [shape: f32[16,256], index: 1, kind: input, shape index: {}]   ;;  %s3153_s3 = inlined_call_operand.vmem [shape: f32[32,128], index: 3, kind: input, shape index: {}]   ;;  %s3154_s0 = inlined_call_operand.vmem [shape: f32[64,16], index: 0, kind: input, shape index: {}]   ;;  %s3155_s4 = inlined_call_operand.vmem [shape: f32[32,128], index: 4, kind: input, shape index: {}]   ;;  %s3156_s2 = inlined_call_operand.vmem [shape: f32[1,256], index: 2, kind: input, shape index: {}]   ;;  %s3157_s5 = inlined_call_operand.vmem [shape: f32[64,128], index: 5, kind: input, shape index: {}]   ;;  %s3158_s6 = inlined_call_operand.vmem [shape: f32[1,128], index: 6, kind: input, shape index: {}]   ;;  %s3159_s7 = inlined_call_operand.vmem [shape: f32[64,128], index: 7, kind: output, shape index: {}]  }
   0x1   :  { %v35_v0 = vld [vmem:[%s3152_s1 + $0x8] sm:$0xff]  ;;  %v37_v1 = vld [vmem:[%s3152_s1 + $0x18] sm:$0xff]  ;;  %v34_v2 = vld [vmem:[%s3152_s1] sm:$0xff]  ;;  %169 = vmatprep.mubr.f32.mxu1 %v2638_v3  ;;  %139 = vmatprep.mubr.f32.mxu0 %v2638_v3  ;;  %v40_v24 = vlaneseq  ;;  %vm213_vm2 = vcmask 261120   ;;  %vm417_vm3 = vcmask 523520   ;;  %vm1898_vm4 = vcmask 523264  }
   0x2   :  { %v2387_v4 = vpack.c.bf16 %v37_v1, %v35_v0  ;;  %v36_v5 = vld [vmem:[%s3152_s1 + $0x10] sm:$0xff]  ;;  %v204_v6 = vld [vmem:[%s3153_s3] sm:$0xff]  ;;  %v205_v8 = vld [vmem:[%s3153_s3 + $0x8] sm:$0xff] }
   0x3   :  { %v2389_v7 = vpack.c.bf16 %v36_v5, %v34_v2  ;;  %v31_v9 = vld [vmem:[%s3154_s0 + $0x28] sm:$0xff]  ;;  %v2706_v10 = vpack.c.bf16 %v205_v8, %v204_v6  ;;  %v26_v11 = vld [vmem:[%s3154_s0] sm:$0xff]  ;;  %v206_v13 = vld [vmem:[%s3153_s3 + $0x10] sm:$0xff]  ;;  %v41_v25 = vshrl.u32 %v40_v24, 7 }
   0x4   :  { %2503 = vmatprep.subr.bf16.mxu1 %v2387_v4  ;;  %2388 = vmatprep.subr.bf16.mxu0 %v2387_v4  ;;  %v207_v14 = vld [vmem:[%s3153_s3 + $0x18] sm:$0xff]  ;;  %v32_v15 = vld [vmem:[%s3154_s0 + $0x30] sm:$0xff]  ;;  %v208_v18 = vld [vmem:[%s3155_s4] sm:$0xff] }
   0x5   :  { %2504 = vmatpush1.bf16.msra.mxu1 %v2389_v7  ;;  %2390 = vmatpush1.bf16.msra.mxu0 %v2389_v7  ;;  %v2726_v16 = vpack.c.bf16 %v207_v14, %v206_v13  ;;  %v33_v17 = vld [vmem:[%s3154_s0 + $0x38] sm:$0xff]  ;;  %v209_v19 = vld [vmem:[%s3155_s4 + $0x8] sm:$0xff]  ;;  %v210_v21 = vld [vmem:[%s3155_s4 + $0x10] sm:$0xff]  ;;  %v42_v30 = vsub.s32 0, %v41_v25  ;;  %v46_v39 = vsub.s32 1, %v41_v25 }
   0x6   :  { %2391 = vmatprep.subr.bf16.mxu1 %v2639_v12  ;;  %2415 = vmatprep.subr.bf16.mxu0 %v2639_v12  ;;  %v2750_v20 = vpack.c.bf16 %v209_v19, %v208_v18  ;;  %v211_v22 = vld [vmem:[%s3155_s4 + $0x18] sm:$0xff]  ;;  %v38_v31 = vld [vmem:[%s3156_s2] sm:$0x3]  ;;  %s2641_s2 = smov 64   ;;  %v27_v4 = vld [vmem:[%s3154_s0 + $0x8] sm:$0xff] }
   0x7   :  { %v2760_v23 = vpack.c.bf16 %v211_v22, %v210_v21  ;;  %v2787_v34 = vrot.slane %v38_v31, %v42_v30  ;;  %v2792_v42 = vrot.slane %v38_v31, %v46_v39 }
   0x8   :  { %2045 = vmatmul.mubr.msk.f32.vlgmr.msra.gmra.mrb[0].mxu1 %vm50_vm0, %v31_v9  ;;  %2040 = vmatmul.mubr.msk.f32.vlgmr.msra.gmra.mrb[0].mxu0 %vm50_vm0, %v26_v11 }
   0x9   :  { %2393 = vmatpush3.bf16.msra.mxu1 %v2706_v10  ;;  %175 = vmatprep.mubr.f32.mxu1 %v2638_v3 }
   0xa   :  { %2394 = vmatprep.subr.bf16.mxu1 %v2639_v12  ;;  %145 = vmatprep.mubr.f32.mxu0 %v2638_v3 }
   0xb   :  { %2417 = vmatpush3.bf16.msra.mxu0 %v2706_v10 }
   0xc   :  { %2046 = vmatmul.mubr.msk.f32.gmra.mrb[2].mxu1 %vm50_vm0, %v32_v15  ;;  %2418 = vmatprep.subr.bf16.mxu0 %v2639_v12 }
   0xd   :  { %181 = vmatprep.mubr.f32.mxu1 %v2638_v3  ;;  %2396 = vmatpush3.bf16.msra.mxu1 %v2726_v16 }
   0xe   :  { %2397 = vmatprep.subr.bf16.mxu1 %v2639_v12  ;;  %2041 = vmatmul.mubr.msk.f32.gmra.mrb[2].mxu0 %vm50_vm0, %v27_v4 }
   0xf   :  { %2420 = vmatpush3.bf16.msra.mxu0 %v2726_v16  ;;  %151 = vmatprep.mubr.f32.mxu0 %v2638_v3 }
  0x10   :  { %2047 = vmatmul.mubr.msk.f32.gmra.mrb[4].mxu1 %vm50_vm0, %v33_v17  ;;  %2427 = vmatprep.subr.bf16.mxu0 %v2639_v12 }
  0x11   :  { %2191 = vmatprep.mubr.msk.f32.mxu1 %vm2640_vm1, %v2638_v3 }
  0x14   :  { %2192 = vmatmul.mubr.f32.vlgmr.msra.gmra.mrb[6].mxu1 %v2638_v3 }
  0x15   :  { %2399 = vmatpush3.bf16.msra.mxu1 %v2750_v20  ;;  %2202 = vmatprep.mubr.msk.f32.mxu1 %vm2640_vm1, %v2638_v3 }
  0x16   :  { %2400 = vmatprep.subr.bf16.mxu1 %v2639_v12 }
  0x19   :  { %2402 = vmatpush3.bf16.msra.mxu1 %v2760_v23 }
  0x1a   :  { %2403 = vmatprep.subr.bf16.mxu1 %v2639_v12 }
  0x1c   :  { %2203 = vmatmul.mubr.f32.vlgmr.msra.gmra.mrb[8].mxu1 %v2638_v3 }
  0x1d   :  { %2405 = vmatpush3.bf16.msra.mxu1 %v2706_v10  ;;  %2213 = vmatprep.mubr.msk.f32.mxu1 %vm2640_vm1, %v2638_v3 }
  0x1e   :  { %2406 = vmatprep.subr.bf16.mxu1 %v2639_v12 }
  0x21   :  { %2408 = vmatpush3.bf16.msra.mxu1 %v2726_v16 }
  0x22   :  { %2409 = vmatprep.subr.bf16.mxu1 %v2639_v12 }
  0xdb   :  { %v2774_v26 = vpop.f32.mrb[0].mxu1  ;;  %v141_v27 = vpop.f32.mrb[0].mxu0 }
  0xdc   :  { %v2776_v28 = vpop.f32.mrb[1].mxu1  ;;  %v2778_v29 = vpop.f32.mrb[1].mxu0  ;;  %v142_v37 = vadd.f32 %v141_v27, %v2787_v34 }
  0xdf   :  { %v2783_v32 = vpop.f32.mrb[2].mxu1 }
  0xe0   :  { %v2785_v33 = vpop.f32.mrb[3].mxu1 }
  0xe1   :  { %v147_v13 = vpop.f32.mrb[2].mxu0  ;;  %v180_v24 = vadd.f32 %v2785_v33, %v2792_v42 }
  0xe2   :  { %v2832_v17 = vpop.f32.mrb[3].mxu0  ;;  %v148_v18 = vadd.f32 %v147_v13, %v2787_v34 }
  0xe3   :  { %v2789_v35 = vpop.f32.mrb[4].mxu1 }
  0xe4   :  { %v185_v36 = vpop.f32.mrb[5].mxu1 }
  0xe5   :  { %v186_v43 = vadd.f32 %v185_v36, %v2792_v42 }
  0xe7   :  { %v283_v38 = vpop.f32.mrb[6].mxu1 }
  0xe8   :  { %v287_v40 = vadd.f32 %v283_v38, %v142_v37  ;;  %v2193_v41 = vpop.f32.mrb[7].mxu1 }
  0xea   :  { %2510 = vtanh.f32 %v287_v40  ;;  %v2048_v49 = vmul.f32 -1.442695, %v287_v40 }
  0xef   :  { %v379_v44 = vpop.f32.mrb[8].mxu1 }
  0xf0   :  { %v383_v45 = vadd.f32 %v379_v44, %v186_v43  ;;  %v2204_v46 = vpop.f32.mrb[9].mxu1 }
  0xf2   :  { %2512 = vtanh.f32 %v383_v45  ;;  %v2049_v50 = vmul.f32 -1.442695, %v383_v45 }
  0xf3   :  { %2514 = vpow2.f32 %v2048_v49 }
  0xf4   :  { %v2511_v47 = vpop.eup %2510  ;;  %2516 = vpow2.f32 %v2049_v50 }
  0xf5   :  { %297 = vrot.lane.b32.xlu0 %v2511_v47, %s2641_s2 }
  0xfc   :  { %v2513_v48 = vpop.eup %2512 }
  0xfd   :  { %393 = vrot.lane.b32.xlu0 %v2513_v48, %s2641_s2  ;;  %v2515_v51 = vpop.eup %2514 }
  0xfe   :  { %v291_v52 = vadd.f32 1.0, %v2515_v51  ;;  %v2517_v53 = vpop.eup %2516 }
  0xff   :  { %v387_v54 = vadd.f32 1.0, %v2517_v53 }
 0x100   :  { %2518 = vrcp.f32 %v291_v52 }
 0x101   :  { %2520 = vrcp.f32 %v387_v54 }
 0x10a   :  { %v2519_v55 = vpop.eup %2518 }
 0x10b   :  { %v2521_v58 = vpop.eup %2520  ;;  %v295_v61 = vmul.f32 0.0, %v2519_v55 }
 0x10c   :  { %v391_v0 = vmul.f32 0.0, %v2521_v58 }
 0x167   :  { %v298_v56 = vpop.permute.xlu0 %297 }
 0x168   :  { %v300_v57 = vmul.f32 %v2519_v55, %v298_v56 }
 0x16a   :  { %302 = vrot.lane.b32.xlu1 %v300_v57, %s2642_s9  ;;  %v29_v57 = vld [vmem:[%s3154_s0 + $0x18] sm:$0xff] }
 0x16f   :  { %v394_v59 = vpop.permute.xlu0 %393 }
 0x170   :  { %v396_v60 = vmul.f32 %v2521_v58, %v394_v59 }
 0x172   :  { %398 = vrot.lane.b32.xlu1 %v396_v60, %s2642_s9 }
 0x1dc   :  { %v303_v62 = vpop.permute.xlu1 %302 }
 0x1dd   :  { %v2799_v63 = vadd.f32 %v303_v62, %v295_v61 }
 0x1df   :  { %2522 = vtanh.f32 %v2799_v63 }
 0x1e4   :  { %v399_v1 = vpop.permute.xlu1 %398 }
 0x1e5   :  { %v2802_v2 = vadd.f32 %v399_v1, %v391_v0 }
 0x1e7   :  { %2524 = vtanh.f32 %v2802_v2 }
 0x1e9   :  { %v2523_v5 = vpop.eup %2522 }
 0x1ea   :  { %308 = vrot.lane.b32.xlu0 %v2523_v5, %s2641_s2 }
 0x1f1   :  { %v2525_v6 = vpop.eup %2524 }
 0x1f2   :  { %404 = vrot.lane.b32.xlu1 %v2525_v6, %s2641_s2 }
 0x25c   :  { %v309_v7 = vpop.permute.xlu0 %308 }
 0x25d   :  { %v311_v8 = vmul.f32 %v2519_v55, %v309_v7  ;;  %v28_v55 = vld [vmem:[%s3154_s0 + $0x10] sm:$0xff] }
 0x25e   :  { %2042 = vmatmul.mubr.msk.f32.gmra.mrb[4].mxu0 %vm50_vm0, %v28_v55 }
 0x25f   :  { %409 = vrot.lane.b32.xlu0 %v311_v8, %s2642_s9  ;;  %157 = vmatprep.mubr.f32.mxu0 %v2638_v3 }
 0x262   :  { %2043 = vmatmul.mubr.msk.f32.gmra.mrb[6].mxu0 %vm50_vm0, %v29_v57 }
 0x263   :  { %163 = vmatprep.mubr.f32.mxu0 %v2638_v3 }
 0x264   :  { %v405_v9 = vpop.permute.xlu1 %404 }
 0x265   :  { %v2813_v11 = vmul.f32 %v2521_v58, %v405_v9  ;;  %v30_v58 = vld [vmem:[%s3154_s0 + $0x20] sm:$0xff] }
 0x266   :  { %2044 = vmatmul.mubr.msk.f32.gmra.mrb[8].mxu0 %vm50_vm0, %v30_v58 }
 0x267   :  { %518 = vrot.lane.b32.xlu1 %v2813_v11, %s2642_s9  ;;  %2235 = vmatprep.mubr.msk.f32.mxu0 %vm2640_vm1, %v2638_v3 }
 0x2d1   :  { %v410_v14 = vpop.permute.xlu0 %409 }
 0x2d2   :  { %412 = vst.msk [vmem:[#allocation3] sm:$0xff] %vm213_vm2, %v410_v14  ;;  %2214 = vmatmul.mubr.msk.f32.vlgmr.msra.gmra.mrb[10].mxu1 %vm213_vm2, %v410_v14 }
 0x2d3   :  { %2411 = vmatpush3.bf16.msra.mxu1 %v2750_v20  ;;  %2224 = vmatprep.mubr.msk.f32.mxu1 %vm2640_vm1, %v2638_v3 }
 0x2d4   :  { %2412 = vmatprep.subr.bf16.mxu1 %v2639_v12 }
 0x2d7   :  { %2414 = vmatpush3.bf16.msra.mxu1 %v2760_v23 }
 0x2d8   :  { %2421 = vmatprep.subr.bf16.mxu1 %v2639_v12 }
 0x2d9   :  { %v519_v15 = vpop.permute.xlu1 %518 }
 0x2da   :  { %2225 = vmatmul.mubr.msk.f32.vlgmr.msra.gmra.mrb[12].mxu1 %vm213_vm2, %v519_v15 }
 0x2db   :  { %2423 = vmatpush3.bf16.msra.mxu1 %v2750_v20  ;;  %2246 = vmatprep.mubr.msk.f32.mxu1 %vm2640_vm1, %v2638_v3 }
 0x2dc   :  { %2424 = vmatprep.subr.bf16.mxu1 %v2639_v12 }
 0x2df   :  { %2426 = vmatpush3.bf16.msra.mxu1 %v2760_v23 }
 0x2e0   :  { %2433 = vmatprep.subr.bf16.mxu1 %v2639_v12 }
 0x331   :  { %v153_v0 = vpop.f32.mrb[4].mxu0 }
 0x332   :  { %v2872_v1 = vpop.f32.mrb[5].mxu0  ;;  %v154_v9 = vadd.f32 %v153_v0, %v2787_v34 }
 0x3a5   :  { %v488_v19 = vpop.f32.mrb[10].mxu1 }
 0x3a6   :  { %v492_v21 = vadd.f32 %v488_v19, %v148_v18  ;;  %v2215_v22 = vpop.f32.mrb[11].mxu1  ;;  %v174_v18 = vadd.f32 %v2776_v28, %v2792_v42 }
 0x3a8   :  { %2526 = vtanh.f32 %v492_v21  ;;  %v2051_v37 = vmul.f32 -1.442695, %v492_v21 }
 0x3ad   :  { %v588_v25 = vpop.f32.mrb[12].mxu1 }
 0x3ae   :  { %v592_v27 = vadd.f32 %v588_v25, %v180_v24  ;;  %v2226_v30 = vpop.f32.mrb[13].mxu1 }
 0x3b0   :  { %2528 = vtanh.f32 %v592_v27  ;;  %v2053_v38 = vmul.f32 -1.442695, %v592_v27 }
 0x3b1   :  { %2530 = vpow2.f32 %v2051_v37 }
 0x3b2   :  { %v2527_v31 = vpop.eup %2526  ;;  %2532 = vpow2.f32 %v2053_v38 }
 0x3b3   :  { %502 = vrot.lane.b32.xlu1 %v2527_v31, %s2641_s2 }
 0x3ba   :  { %v2529_v36 = vpop.eup %2528 }
 0x3bb   :  { %602 = vrot.lane.b32.xlu0 %v2529_v36, %s2641_s2  ;;  %v2531_v39 = vpop.eup %2530 }
 0x3bc   :  { %v496_v40 = vadd.f32 1.0, %v2531_v39  ;;  %v2533_v41 = vpop.eup %2532 }
 0x3bd   :  { %v596_v43 = vadd.f32 1.0, %v2533_v41 }
 0x3be   :  { %2534 = vrcp.f32 %v496_v40 }
 0x3bf   :  { %2536 = vrcp.f32 %v596_v43 }
 0x3c8   :  { %v2535_v33 = vpop.eup %2534 }
 0x3c9   :  { %v2537_v46 = vpop.eup %2536  ;;  %v500_v49 = vmul.f32 %v2535_v33, %v2799_v63 }
 0x3ca   :  { %v600_v52 = vmul.f32 %v2537_v46, %v2802_v2  ;;  %v2874_v2 = vpop.f32.mrb[6].mxu0 }
 0x3cb   :  { %v2876_v4 = vpop.f32.mrb[7].mxu0  ;;  %v160_v58 = vadd.f32 %v2874_v2, %v2787_v34 }
 0x3cc   :  { %v2878_v5 = vpop.f32.mrb[8].mxu0 }
 0x3cd   :  { %v2880_v6 = vpop.f32.mrb[9].mxu0 }
 0x425   :  { %v503_v44 = vpop.permute.xlu1 %502 }
 0x426   :  { %v505_v45 = vmul.f32 %v2535_v33, %v503_v44 }
 0x428   :  { %507 = vrot.lane.b32.xlu1 %v505_v45, %s2642_s9 }
 0x42d   :  { %v603_v47 = vpop.permute.xlu0 %602 }
 0x42e   :  { %v605_v48 = vmul.f32 %v2537_v46, %v603_v47 }
 0x430   :  { %607 = vrot.lane.b32.xlu0 %v605_v48, %s2642_s9 }
 0x49a   :  { %v508_v50 = vpop.permute.xlu1 %507 }
 0x49b   :  { %v2842_v51 = vadd.f32 %v508_v50, %v500_v49 }
 0x49d   :  { %2538 = vtanh.f32 %v2842_v51 }
 0x4a2   :  { %v608_v53 = vpop.permute.xlu0 %607 }
 0x4a3   :  { %v2846_v54 = vadd.f32 %v608_v53, %v600_v52 }
 0x4a5   :  { %2540 = vtanh.f32 %v2846_v54 }
 0x4a7   :  { %v2539_v56 = vpop.eup %2538 }
 0x4a8   :  { %513 = vrot.lane.b32.xlu1 %v2539_v56, %s2641_s2 }
 0x4af   :  { %v2541_v59 = vpop.eup %2540 }
 0x4b0   :  { %613 = vrot.lane.b32.xlu0 %v2541_v59, %s2641_s2 }
 0x51a   :  { %v514_v60 = vpop.permute.xlu1 %513 }
 0x51b   :  { %v516_v61 = vmul.f32 %v2535_v33, %v514_v60 }
 0x51d   :  { %618 = vrot.lane.b32.xlu1 %v516_v61, %s2642_s9 }
 0x522   :  { %v614_v62 = vpop.permute.xlu0 %613 }
 0x523   :  { %v2868_v63 = vmul.f32 %v2537_v46, %v614_v62  ;;  %v168_v62 = vadd.f32 %v2880_v6, %v2792_v42 }
 0x525   :  { %726 = vrot.lane.b32.xlu0 %v2868_v63, %s2642_s9 }
 0x58f   :  { %v619_v7 = vpop.permute.xlu1 %618 }
 0x590   :  { %621 = vst.msk [vmem:[#allocation3 + $0x8] sm:$0xff] %vm213_vm2, %v619_v7  ;;  %2236 = vmatmul.mubr.msk.f32.vlgmr.msra.gmra.mrb[10].mxu0 %vm213_vm2, %v619_v7 }
 0x591   :  { %2429 = vmatpush3.bf16.msra.mxu0 %v2706_v10  ;;  %2257 = vmatprep.mubr.msk.f32.mxu0 %vm2640_vm1, %v2638_v3 }
 0x592   :  { %2430 = vmatprep.subr.bf16.mxu0 %v2639_v12 }
 0x595   :  { %2432 = vmatpush3.bf16.msra.mxu0 %v2726_v16 }
 0x596   :  { %2439 = vmatprep.subr.bf16.mxu0 %v2639_v12 }
 0x597   :  { %v727_v8 = vpop.permute.xlu0 %726 }
 0x598   :  { %2247 = vmatmul.mubr.msk.f32.vlgmr.msra.gmra.mrb[14].mxu1 %vm213_vm2, %v727_v8 }
 0x599   :  { %2435 = vmatpush3.bf16.msra.mxu1 %v2750_v20  ;;  %2268 = vmatprep.mubr.msk.f32.mxu1 %vm2640_vm1, %v2638_v3 }
 0x59a   :  { %2436 = vmatprep.subr.bf16.mxu1 %v2639_v12 }
 0x59d   :  { %2438 = vmatpush3.bf16.msra.mxu1 %v2760_v23 }
 0x59e   :  { %2445 = vmatprep.subr.bf16.mxu1 %v2639_v12 }
 0x663   :  { %v696_v13 = vpop.f32.mrb[10].mxu0 }
 0x664   :  { %v700_v14 = vadd.f32 %v696_v13, %v154_v9  ;;  %v2237_v15 = vpop.f32.mrb[11].mxu0 }
 0x666   :  { %2542 = vtanh.f32 %v700_v14  ;;  %v2055_v27 = vmul.f32 -1.442695, %v700_v14 }
 0x66b   :  { %v796_v19 = vpop.f32.mrb[14].mxu1 }
 0x66c   :  { %v800_v21 = vadd.f32 %v796_v19, %v174_v18  ;;  %v2248_v22 = vpop.f32.mrb[15].mxu1 }
 0x66e   :  { %2544 = vtanh.f32 %v800_v21  ;;  %v2057_v30 = vmul.f32 -1.442695, %v800_v21 }
 0x66f   :  { %2546 = vpow2.f32 %v2055_v27 }
 0x670   :  { %v2543_v24 = vpop.eup %2542  ;;  %2548 = vpow2.f32 %v2057_v30 }
 0x671   :  { %710 = vrot.lane.b32.xlu1 %v2543_v24, %s2641_s2 }
 0x678   :  { %v2545_v25 = vpop.eup %2544 }
 0x679   :  { %810 = vrot.lane.b32.xlu0 %v2545_v25, %s2641_s2  ;;  %v2547_v31 = vpop.eup %2546 }
 0x67a   :  { %v704_v36 = vadd.f32 1.0, %v2547_v31  ;;  %v2549_v37 = vpop.eup %2548 }
 0x67b   :  { %v804_v38 = vadd.f32 1.0, %v2549_v37 }
 0x67c   :  { %2550 = vrcp.f32 %v704_v36 }
 0x67d   :  { %2552 = vrcp.f32 %v804_v38 }
 0x686   :  { %v2551_v28 = vpop.eup %2550 }
 0x687   :  { %v2553_v41 = vpop.eup %2552  ;;  %v708_v44 = vmul.f32 %v2551_v28, %v2842_v51 }
 0x688   :  { %v808_v47 = vmul.f32 %v2553_v41, %v2846_v54 }
 0x6e3   :  { %v711_v39 = vpop.permute.xlu1 %710 }
 0x6e4   :  { %v713_v40 = vmul.f32 %v2551_v28, %v711_v39 }
 0x6e6   :  { %715 = vrot.lane.b32.xlu1 %v713_v40, %s2642_s9 }
 0x6eb   :  { %v811_v43 = vpop.permute.xlu0 %810 }
 0x6ec   :  { %v813_v33 = vmul.f32 %v2553_v41, %v811_v43 }
 0x6ee   :  { %815 = vrot.lane.b32.xlu0 %v813_v33, %s2642_s9 }
 0x758   :  { %v716_v45 = vpop.permute.xlu1 %715 }
 0x759   :  { %v2905_v46 = vadd.f32 %v716_v45, %v708_v44 }
 0x75b   :  { %2554 = vtanh.f32 %v2905_v46 }
 0x760   :  { %v816_v48 = vpop.permute.xlu0 %815 }
 0x761   :  { %v2909_v49 = vadd.f32 %v816_v48, %v808_v47  ;;  %v166_v48 = vadd.f32 %v2878_v5, %v2787_v34 }
 0x763   :  { %2556 = vtanh.f32 %v2909_v49 }
 0x765   :  { %v2555_v50 = vpop.eup %2554 }
 0x766   :  { %721 = vrot.lane.b32.xlu1 %v2555_v50, %s2641_s2 }
 0x76d   :  { %v2557_v52 = vpop.eup %2556 }
 0x76e   :  { %821 = vrot.lane.b32.xlu0 %v2557_v52, %s2641_s2 }
 0x7d8   :  { %v722_v53 = vpop.permute.xlu1 %721 }
 0x7d9   :  { %v724_v51 = vmul.f32 %v2551_v28, %v722_v53  ;;  %v162_v53 = vadd.f32 %v2876_v4, %v2792_v42 }
 0x7db   :  { %826 = vrot.lane.b32.xlu1 %v724_v51, %s2642_s9 }
 0x7e0   :  { %v822_v55 = vpop.permute.xlu0 %821 }
 0x7e1   :  { %v2915_v56 = vmul.f32 %v2553_v41, %v822_v55 }
 0x7e3   :  { %934 = vrot.lane.b32.xlu0 %v2915_v56, %s2642_s9 }
 0x84d   :  { %v827_v54 = vpop.permute.xlu1 %826 }
 0x84e   :  { %829 = vst.msk [vmem:[#allocation3 + $0x10] sm:$0xff] %vm213_vm2, %v827_v54  ;;  %2258 = vmatmul.mubr.msk.f32.vlgmr.msra.gmra.mrb[12].mxu0 %vm213_vm2, %v827_v54 }
 0x84f   :  { %2441 = vmatpush3.bf16.msra.mxu0 %v2706_v10  ;;  %2279 = vmatprep.mubr.msk.f32.mxu0 %vm2640_vm1, %v2638_v3 }
 0x850   :  { %2442 = vmatprep.subr.bf16.mxu0 %v2639_v12 }
 0x853   :  { %2444 = vmatpush3.bf16.msra.mxu0 %v2726_v16 }
 0x854   :  { %2451 = vmatprep.subr.bf16.mxu0 %v2639_v12 }
 0x855   :  { %v935_v57 = vpop.permute.xlu0 %934 }
 0x856   :  { %2269 = vmatmul.mubr.msk.f32.vlgmr.msra.gmra.mrb[16].mxu1 %vm213_vm2, %v935_v57 }
 0x857   :  { %2447 = vmatpush3.bf16.msra.mxu1 %v2750_v20  ;;  %2290 = vmatprep.mubr.msk.f32.mxu1 %vm2640_vm1, %v2638_v3 }
 0x858   :  { %2448 = vmatprep.subr.bf16.mxu1 %v2639_v12 }
 0x85b   :  { %2450 = vmatpush3.bf16.msra.mxu1 %v2760_v23 }
 0x85c   :  { %2457 = vmatprep.subr.bf16.mxu1 %v2639_v12 }
 0x921   :  { %v904_v59 = vpop.f32.mrb[12].mxu0 }
 0x922   :  { %v908_v60 = vadd.f32 %v904_v59, %v160_v58  ;;  %v2259_v61 = vpop.f32.mrb[13].mxu0 }
 0x924   :  { %2558 = vtanh.f32 %v908_v60  ;;  %v2059_v14 = vmul.f32 -1.442695, %v908_v60 }
 0x929   :  { %v1004_v0 = vpop.f32.mrb[16].mxu1 }
 0x92a   :  { %v1008_v7 = vadd.f32 %v1004_v0, %v168_v62  ;;  %v2270_v8 = vpop.f32.mrb[17].mxu1 }
 0x92c   :  { %2560 = vtanh.f32 %v1008_v7  ;;  %v2061_v2 = vmul.f32 -1.442695, %v1008_v7 }
 0x92d   :  { %2562 = vpow2.f32 %v2059_v14 }
 0x92e   :  { %v2559_v9 = vpop.eup %2558  ;;  %2564 = vpow2.f32 %v2061_v2 }
 0x92f   :  { %918 = vrot.lane.b32.xlu1 %v2559_v9, %s2641_s2 }
 0x936   :  { %v2561_v13 = vpop.eup %2560 }
 0x937   :  { %1018 = vrot.lane.b32.xlu0 %v2561_v13, %s2641_s2  ;;  %v2563_v15 = vpop.eup %2562 }
 0x938   :  { %v912_v18 = vadd.f32 1.0, %v2563_v15  ;;  %v2565_v19 = vpop.eup %2564 }
 0x939   :  { %v1012_v21 = vadd.f32 1.0, %v2565_v19 }
 0x93a   :  { %2566 = vrcp.f32 %v912_v18 }
 0x93b   :  { %2568 = vrcp.f32 %v1012_v21 }
 0x944   :  { %v2567_v6 = vpop.eup %2566 }
 0x945   :  { %v2569_v25 = vpop.eup %2568  ;;  %v916_v31 = vmul.f32 %v2567_v6, %v2905_v46 }
 0x946   :  { %v1016_v38 = vmul.f32 %v2569_v25, %v2909_v49 }
 0x9a1   :  { %v919_v22 = vpop.permute.xlu1 %918 }
 0x9a2   :  { %v921_v24 = vmul.f32 %v2567_v6, %v919_v22 }
 0x9a4   :  { %923 = vrot.lane.b32.xlu1 %v921_v24, %s2642_s9 }
 0x9a9   :  { %v1019_v27 = vpop.permute.xlu0 %1018 }
 0x9aa   :  { %v1021_v30 = vmul.f32 %v2569_v25, %v1019_v27 }
 0x9ac   :  { %1023 = vrot.lane.b32.xlu0 %v1021_v30, %s2642_s9 }
 0xa16   :  { %v924_v36 = vpop.permute.xlu1 %923 }
 0xa17   :  { %v2943_v37 = vadd.f32 %v924_v36, %v916_v31 }
 0xa19   :  { %2570 = vtanh.f32 %v2943_v37 }
 0xa1e   :  { %v1024_v28 = vpop.permute.xlu0 %1023 }
 0xa1f   :  { %v2947_v39 = vadd.f32 %v1024_v28, %v1016_v38  ;;  %v172_v38 = vadd.f32 %v2774_v26, %v2787_v34 }
 0xa21   :  { %2572 = vtanh.f32 %v2947_v39 }
 0xa23   :  { %v2571_v40 = vpop.eup %2570 }
 0xa24   :  { %929 = vrot.lane.b32.xlu1 %v2571_v40, %s2641_s2 }
 0xa2b   :  { %v2573_v41 = vpop.eup %2572 }
 0xa2c   :  { %1029 = vrot.lane.b32.xlu0 %v2573_v41, %s2641_s2  ;;  %v156_v41 = vadd.f32 %v2872_v1, %v2792_v42 }
 0xa96   :  { %v930_v43 = vpop.permute.xlu1 %929 }
 0xa97   :  { %v932_v33 = vmul.f32 %v2567_v6, %v930_v43 }
 0xa99   :  { %1034 = vrot.lane.b32.xlu1 %v932_v33, %s2642_s9 }
 0xa9e   :  { %v1030_v44 = vpop.permute.xlu0 %1029 }
 0xa9f   :  { %v2953_v45 = vmul.f32 %v2569_v25, %v1030_v44 }
 0xaa1   :  { %1142 = vrot.lane.b32.xlu0 %v2953_v45, %s2642_s9 }
 0xb0b   :  { %v1035_v46 = vpop.permute.xlu1 %1034 }
 0xb0c   :  { %1037 = vst.msk [vmem:[#allocation3 + $0x18] sm:$0xff] %vm213_vm2, %v1035_v46  ;;  %2280 = vmatmul.mubr.msk.f32.vlgmr.msra.gmra.mrb[14].mxu0 %vm213_vm2, %v1035_v46 }
 0xb0d   :  { %2453 = vmatpush3.bf16.msra.mxu0 %v2706_v10  ;;  %2301 = vmatprep.mubr.msk.f32.mxu0 %vm2640_vm1, %v2638_v3 }
 0xb0e   :  { %2454 = vmatprep.subr.bf16.mxu0 %v2639_v12 }
 0xb11   :  { %2456 = vmatpush3.bf16.msra.mxu0 %v2726_v16 }
 0xb12   :  { %2463 = vmatprep.subr.bf16.mxu0 %v2639_v12 }
 0xb13   :  { %v1143_v47 = vpop.permute.xlu0 %1142 }
 0xb14   :  { %2291 = vmatmul.mubr.msk.f32.vlgmr.msra.gmra.mrb[18].mxu1 %vm213_vm2, %v1143_v47 }
 0xb15   :  { %2459 = vmatpush3.bf16.msra.mxu1 %v2750_v20  ;;  %2312 = vmatprep.mubr.msk.f32.mxu1 %vm2640_vm1, %v2638_v3 }
 0xb16   :  { %2460 = vmatprep.subr.bf16.mxu1 %v2639_v12 }
 0xb19   :  { %2462 = vmatpush3.bf16.msra.mxu1 %v2760_v23 }
 0xb1a   :  { %2469 = vmatprep.subr.bf16.mxu1 %v2639_v12 }
 0xbdf   :  { %v1112_v49 = vpop.f32.mrb[14].mxu0 }
 0xbe0   :  { %v1116_v50 = vadd.f32 %v1112_v49, %v166_v48  ;;  %v2281_v52 = vpop.f32.mrb[15].mxu0 }
 0xbe2   :  { %2574 = vtanh.f32 %v1116_v50  ;;  %v2063_v59 = vmul.f32 -1.442695, %v1116_v50 }
 0xbe7   :  { %v1212_v51 = vpop.f32.mrb[18].mxu1 }
 0xbe8   :  { %v1216_v55 = vadd.f32 %v1212_v51, %v162_v53  ;;  %v2292_v54 = vpop.f32.mrb[19].mxu1 }
 0xbea   :  { %2576 = vtanh.f32 %v1216_v55  ;;  %v2065_v5 = vmul.f32 -1.442695, %v1216_v55 }
 0xbeb   :  { %2578 = vpow2.f32 %v2063_v59 }
 0xbec   :  { %v2575_v57 = vpop.eup %2574  ;;  %2580 = vpow2.f32 %v2065_v5 }
 0xbed   :  { %1126 = vrot.lane.b32.xlu1 %v2575_v57, %s2641_s2 }
 0xbf4   :  { %v2577_v58 = vpop.eup %2576 }
 0xbf5   :  { %1226 = vrot.lane.b32.xlu0 %v2577_v58, %s2641_s2  ;;  %v2579_v60 = vpop.eup %2578 }
 0xbf6   :  { %v1120_v61 = vadd.f32 1.0, %v2579_v60  ;;  %v2581_v62 = vpop.eup %2580 }
 0xbf7   :  { %v1220_v0 = vadd.f32 1.0, %v2581_v62 }
 0xbf8   :  { %2582 = vrcp.f32 %v1120_v61 }
 0xbf9   :  { %2584 = vrcp.f32 %v1220_v0 }
 0xc02   :  { %v2583_v4 = vpop.eup %2582 }
 0xc03   :  { %v2585_v9 = vpop.eup %2584  ;;  %v1124_v2 = vmul.f32 %v2583_v4, %v2943_v37 }
 0xc04   :  { %v1224_v19 = vmul.f32 %v2585_v9, %v2947_v39 }
 0xc5f   :  { %v1127_v7 = vpop.permute.xlu1 %1126 }
 0xc60   :  { %v1129_v8 = vmul.f32 %v2583_v4, %v1127_v7 }
 0xc62   :  { %1131 = vrot.lane.b32.xlu1 %v1129_v8, %s2642_s9 }
 0xc67   :  { %v1227_v13 = vpop.permute.xlu0 %1226 }
 0xc68   :  { %v1229_v14 = vmul.f32 %v2585_v9, %v1227_v13 }
 0xc6a   :  { %1231 = vrot.lane.b32.xlu0 %v1229_v14, %s2642_s9 }
 0xcd4   :  { %v1132_v15 = vpop.permute.xlu1 %1131 }
 0xcd5   :  { %v1134_v18 = vadd.f32 %v1132_v15, %v1124_v2 }
 0xcd7   :  { %2586 = vtanh.f32 %v1134_v18 }
 0xcdc   :  { %v1232_v21 = vpop.permute.xlu0 %1231 }
 0xcdd   :  { %v1234_v6 = vadd.f32 %v1232_v21, %v1224_v19 }
 0xcdf   :  { %2588 = vtanh.f32 %v1234_v6 }
 0xce1   :  { %v2587_v22 = vpop.eup %2586 }
 0xce2   :  { %1137 = vrot.lane.b32.xlu1 %v2587_v22, %s2641_s2 }
 0xce9   :  { %v2589_v24 = vpop.eup %2588 }
 0xcea   :  { %1237 = vrot.lane.b32.xlu0 %v2589_v24, %s2641_s2 }
 0xd54   :  { %v1138_v25 = vpop.permute.xlu1 %1137 }
 0xd55   :  { %v1140_v27 = vmul.f32 %v2583_v4, %v1138_v25 }
 0xd57   :  { %1242 = vrot.lane.b32.xlu1 %v1140_v27, %s2642_s9 }
 0xd5c   :  { %v1238_v30 = vpop.permute.xlu0 %1237 }
 0xd5d   :  { %v2985_v31 = vmul.f32 %v2585_v9, %v1238_v30 }
 0xd5f   :  { %1350 = vrot.lane.b32.xlu0 %v2985_v31, %s2642_s9 }
 0xdc9   :  { %v2989_v36 = vpop.permute.xlu1 %1242 }
 0xdca   :  { %2302 = vmatmul.mubr.msk.f32.vlgmr.msra.gmra.mrb[16].mxu0 %vm213_vm2, %v2989_v36 }
 0xdcb   :  { %2465 = vmatpush3.bf16.msra.mxu0 %v2706_v10  ;;  %2323 = vmatprep.mubr.msk.f32.mxu0 %vm2640_vm1, %v2638_v3 }
 0xdcc   :  { %2466 = vmatprep.subr.bf16.mxu0 %v2639_v12 }
 0xdcf   :  { %2468 = vmatpush3.bf16.msra.mxu0 %v2726_v16 }
 0xdd0   :  { %2475 = vmatprep.subr.bf16.mxu0 %v2639_v12 }
 0xdd1   :  { %v1351_v37 = vpop.permute.xlu0 %1350 }
 0xdd2   :  { %2313 = vmatmul.mubr.msk.f32.vlgmr.msra.gmra.mrb[20].mxu1 %vm213_vm2, %v1351_v37 }
 0xdd3   :  { %2471 = vmatpush3.bf16.msra.mxu1 %v2750_v20  ;;  %2334 = vmatprep.mubr.msk.f32.mxu1 %vm2640_vm1, %v2638_v3 }
 0xdd4   :  { %2472 = vmatprep.subr.bf16.mxu1 %v2639_v12 }
 0xdd7   :  { %2474 = vmatpush3.bf16.msra.mxu1 %v2760_v23 }
 0xdd8   :  { %2481 = vmatprep.subr.bf16.mxu1 %v2639_v12 }
 0xe9d   :  { %v1320_v28 = vpop.f32.mrb[16].mxu0 }
 0xe9e   :  { %v1324_v39 = vadd.f32 %v1320_v28, %v172_v38  ;;  %v2303_v40 = vpop.f32.mrb[17].mxu0 }
 0xea0   :  { %2590 = vtanh.f32 %v1324_v39  ;;  %v2067_v48 = vmul.f32 -1.442695, %v1324_v39 }
 0xea5   :  { %v1420_v43 = vpop.f32.mrb[20].mxu1 }
 0xea6   :  { %v1424_v33 = vadd.f32 %v1420_v43, %v156_v41  ;;  %v2314_v44 = vpop.f32.mrb[21].mxu1 }
 0xea8   :  { %2592 = vtanh.f32 %v1424_v33  ;;  %v2069_v26 = vmul.f32 -1.442695, %v1424_v33 }
 0xea9   :  { %2594 = vpow2.f32 %v2067_v48 }
 0xeaa   :  { %v2591_v46 = vpop.eup %2590  ;;  %2596 = vpow2.f32 %v2069_v26 }
 0xeab   :  { %1334 = vrot.lane.b32.xlu1 %v2591_v46, %s2641_s2 }
 0xeb2   :  { %v2593_v47 = vpop.eup %2592 }
 0xeb3   :  { %1434 = vrot.lane.b32.xlu0 %v2593_v47, %s2641_s2  ;;  %v2595_v49 = vpop.eup %2594 }
 0xeb4   :  { %v1328_v50 = vadd.f32 1.0, %v2595_v49  ;;  %v2597_v52 = vpop.eup %2596 }
 0xeb5   :  { %v1428_v53 = vadd.f32 1.0, %v2597_v52 }
 0xeb6   :  { %2598 = vrcp.f32 %v1328_v50 }
 0xeb7   :  { %2600 = vrcp.f32 %v1428_v53 }
 0xec0   :  { %v2599_v1 = vpop.eup %2598 }
 0xec1   :  { %v2601_v54 = vpop.eup %2600  ;;  %v1332_v59 = vmul.f32 %v2599_v1, %v1134_v18 }
 0xec2   :  { %v1432_v61 = vmul.f32 %v2601_v54, %v1234_v6 }
 0xf1d   :  { %v1335_v51 = vpop.permute.xlu1 %1334 }
 0xf1e   :  { %v1337_v55 = vmul.f32 %v2599_v1, %v1335_v51 }
 0xf20   :  { %1339 = vrot.lane.b32.xlu1 %v1337_v55, %s2642_s9  ;;  %v184_v55 = vadd.f32 %v2789_v35, %v2787_v34 }
 0xf25   :  { %v1435_v57 = vpop.permute.xlu0 %1434 }
 0xf26   :  { %v1437_v58 = vmul.f32 %v2601_v54, %v1435_v57 }
 0xf28   :  { %1439 = vrot.lane.b32.xlu0 %v1437_v58, %s2642_s9 }
 0xf92   :  { %v1340_v5 = vpop.permute.xlu1 %1339 }
 0xf93   :  { %v1342_v60 = vadd.f32 %v1340_v5, %v1332_v59  ;;  %v144_v59 = vadd.f32 %v2778_v29, %v2792_v42 }
 0xf95   :  { %2602 = vtanh.f32 %v1342_v60 }
 0xf9a   :  { %v1440_v62 = vpop.permute.xlu0 %1439 }
 0xf9b   :  { %v1442_v0 = vadd.f32 %v1440_v62, %v1432_v61 }
 0xf9d   :  { %2604 = vtanh.f32 %v1442_v0 }
 0xf9f   :  { %v2603_v4 = vpop.eup %2602 }
 0xfa0   :  { %1345 = vrot.lane.b32.xlu1 %v2603_v4, %s2641_s2 }
 0xfa7   :  { %v2605_v7 = vpop.eup %2604 }
 0xfa8   :  { %1445 = vrot.lane.b32.xlu0 %v2605_v7, %s2641_s2 }
0x1012   :  { %v1346_v8 = vpop.permute.xlu1 %1345 }
0x1013   :  { %v1348_v9 = vmul.f32 %v2599_v1, %v1346_v8 }
0x1015   :  { %1450 = vrot.lane.b32.xlu1 %v1348_v9, %s2642_s9 }
0x101a   :  { %v1446_v13 = vpop.permute.xlu0 %1445 }
0x101b   :  { %v3017_v14 = vmul.f32 %v2601_v54, %v1446_v13 }
0x101d   :  { %1558 = vrot.lane.b32.xlu0 %v3017_v14, %s2642_s9 }
0x1087   :  { %v3021_v2 = vpop.permute.xlu1 %1450 }
0x1088   :  { %2324 = vmatmul.mubr.msk.f32.vlgmr.msra.gmra.mrb[18].mxu0 %vm213_vm2, %v3021_v2 }
0x1089   :  { %2477 = vmatpush3.bf16.msra.mxu0 %v2706_v10  ;;  %2345 = vmatprep.mubr.msk.f32.mxu0 %vm2640_vm1, %v2638_v3  ;;  %v178_v10 = vadd.f32 %v2783_v32, %v2787_v34 }
0x108a   :  { %2478 = vmatprep.subr.bf16.mxu0 %v2639_v12 }
0x108d   :  { %2480 = vmatpush3.bf16.msra.mxu0 %v2726_v16  ;;  %v150_v16 = vadd.f32 %v2832_v17, %v2792_v42 }
0x108f   :  { %v1559_v15 = vpop.permute.xlu0 %1558 }
0x1090   :  { %2335 = vmatmul.mubr.msk.f32.vlgmr.msra.gmra.mrb[22].mxu1 %vm213_vm2, %v1559_v15 }
0x1091   :  { %2483 = vmatpush3.bf16.msra.mxu1 %v2750_v20  ;;  %2356 = vmatprep.mubr.msk.f32.mxu1 %vm2640_vm1, %v2638_v3 }
0x1092   :  { %2484 = vmatprep.subr.bf16.mxu1 %v2639_v12 }
0x1095   :  { %2486 = vmatpush3.bf16.msra.mxu1 %v2760_v23 }
0x115b   :  { %v1528_v18 = vpop.f32.mrb[18].mxu0 }
0x115c   :  { %v1532_v19 = vadd.f32 %v1528_v18, %v178_v10  ;;  %v2325_v21 = vpop.f32.mrb[19].mxu0 }
0x115e   :  { %2606 = vtanh.f32 %v1532_v19  ;;  %v2071_v12 = vmul.f32 -1.442695, %v1532_v19 }
0x1163   :  { %v1628_v6 = vpop.f32.mrb[22].mxu1 }
0x1164   :  { %v1632_v22 = vadd.f32 %v1628_v6, %v150_v16  ;;  %v2336_v20 = vpop.f32.mrb[23].mxu1 }
0x1166   :  { %2608 = vtanh.f32 %v1632_v22  ;;  %v2073_v23 = vmul.f32 -1.442695, %v1632_v22 }
0x1167   :  { %2610 = vpow2.f32 %v2071_v12  ;;  %v1883_v12 = vld [vmem:[%s3157_s5] sm:$0xff] }
0x1168   :  { %v2607_v24 = vpop.eup %2606  ;;  %2612 = vpow2.f32 %v2073_v23  ;;  %v1884_v23 = vld [vmem:[%s3157_s5 + $0x8] sm:$0xff] }
0x1169   :  { %1542 = vrot.lane.b32.xlu1 %v2607_v24, %s2641_s2 }
0x1170   :  { %v2609_v3 = vpop.eup %2608 }
0x1171   :  { %1642 = vrot.lane.b32.xlu0 %v2609_v3, %s2641_s2  ;;  %v2611_v32 = vpop.eup %2610 }
0x1172   :  { %v1536_v25 = vadd.f32 1.0, %v2611_v32  ;;  %v2613_v27 = vpop.eup %2612  ;;  %v1885_v32 = vld [vmem:[%s3157_s5 + $0x10] sm:$0xff] }
0x1173   :  { %v1636_v30 = vadd.f32 1.0, %v2613_v27  ;;  %v1887_v27 = vld [vmem:[%s3157_s5 + $0x20] sm:$0xff] }
0x1174   :  { %2614 = vrcp.f32 %v1536_v25  ;;  %v2487_v25 = vpack.c.bf16 %v1884_v23, %v1883_v12 }
0x1175   :  { %2616 = vrcp.f32 %v1636_v30  ;;  %v1888_v30 = vld [vmem:[%s3157_s5 + $0x28] sm:$0xff] }
0x1176   :  { %2488 = vmatprep.subr.bf16.mxu0 %v2487_v25 }
0x117e   :  { %v2615_v17 = vpop.eup %2614 }
0x117f   :  { %v2617_v28 = vpop.eup %2616  ;;  %v1540_v41 = vmul.f32 %v2615_v17, %v1342_v60 }
0x1180   :  { %v1640_v44 = vmul.f32 %v2617_v28, %v1442_v0 }
0x11db   :  { %v1543_v37 = vpop.permute.xlu1 %1542 }
0x11dc   :  { %v1545_v38 = vmul.f32 %v2615_v17, %v1543_v37 }
0x11de   :  { %1547 = vrot.lane.b32.xlu1 %v1545_v38, %s2642_s9  ;;  %v1890_v38 = vld [vmem:[%s3157_s5 + $0x38] sm:$0xff] }
0x11e3   :  { %v1643_v39 = vpop.permute.xlu0 %1642 }
0x11e4   :  { %v1645_v40 = vmul.f32 %v2617_v28, %v1643_v39 }
0x11e6   :  { %1647 = vrot.lane.b32.xlu0 %v1645_v40, %s2642_s9 }
0x1250   :  { %v1548_v43 = vpop.permute.xlu1 %1547 }
0x1251   :  { %v1550_v33 = vadd.f32 %v1548_v43, %v1540_v41 }
0x1253   :  { %2618 = vtanh.f32 %v1550_v33 }
0x1258   :  { %v1648_v46 = vpop.permute.xlu0 %1647 }
0x1259   :  { %v1650_v47 = vadd.f32 %v1648_v46, %v1640_v44 }
0x125b   :  { %2620 = vtanh.f32 %v1650_v47 }
0x125d   :  { %v2619_v48 = vpop.eup %2618 }
0x125e   :  { %1553 = vrot.lane.b32.xlu1 %v2619_v48, %s2641_s2 }
0x1265   :  { %v2621_v26 = vpop.eup %2620 }
0x1266   :  { %1653 = vrot.lane.b32.xlu0 %v2621_v26, %s2641_s2 }
0x12d0   :  { %v1554_v49 = vpop.permute.xlu1 %1553 }
0x12d1   :  { %v1556_v50 = vmul.f32 %v2615_v17, %v1554_v49  ;;  %v2495_v17 = vpack.c.bf16 %v1888_v30, %v1887_v27 }
0x12d3   :  { %1658 = vrot.lane.b32.xlu1 %v1556_v50, %s2642_s9 }
0x12d8   :  { %v1654_v52 = vpop.permute.xlu0 %1653 }
0x12d9   :  { %v1656_v53 = vmul.f32 %v2617_v28, %v1654_v52 }
0x12db   :  { %1766 = vrot.lane.b32.xlu0 %v1656_v53, %s2642_s9 }
0x1345   :  { %v3048_v1 = vpop.permute.xlu1 %1658 }
0x1346   :  { %2346 = vmatmul.mubr.msk.f32.vlgmr.msra.gmra.mrb[20].mxu0 %vm213_vm2, %v3048_v1 }
0x1347   :  { %2490 = vmatpush3.bf16.msra.mxu0 %v2487_v25 }
0x134d   :  { %v1767_v51 = vpop.permute.xlu0 %1766 }
0x134e   :  { %2357 = vmatmul.mubr.msk.f32.vlgmr.msra.gmra.mrb[24].mxu1 %vm213_vm2, %v1767_v51 }
0x1419   :  { %v1736_v54 = vpop.f32.mrb[20].mxu0 }
0x141a   :  { %v1740_v57 = vadd.f32 %v1736_v54, %v184_v55  ;;  %v2347_v58 = vpop.f32.mrb[21].mxu0 }
0x141c   :  { %2622 = vtanh.f32 %v1740_v57  ;;  %v2075_v4 = vmul.f32 -1.442695, %v1740_v57 }
0x1421   :  { %v1836_v5 = vpop.f32.mrb[24].mxu1 }
0x1422   :  { %v1840_v60 = vadd.f32 %v1836_v5, %v144_v59  ;;  %v2358_v61 = vpop.f32.mrb[25].mxu1 }
0x1424   :  { %2624 = vtanh.f32 %v1840_v60  ;;  %v2077_v34 = vmul.f32 -1.442695, %v1840_v60 }
0x1425   :  { %2626 = vpow2.f32 %v2075_v4 }
0x1426   :  { %v2623_v62 = vpop.eup %2622  ;;  %2628 = vpow2.f32 %v2077_v34 }
0x1427   :  { %1750 = vrot.lane.b32.xlu1 %v2623_v62, %s2641_s2 }
0x142e   :  { %v2625_v0 = vpop.eup %2624 }
0x142f   :  { %1850 = vrot.lane.b32.xlu0 %v2625_v0, %s2641_s2  ;;  %v2627_v35 = vpop.eup %2626 }
0x1430   :  { %v1744_v7 = vadd.f32 1.0, %v2627_v35  ;;  %v2629_v8 = vpop.eup %2628 }
0x1431   :  { %v1844_v9 = vadd.f32 1.0, %v2629_v8 }
0x1432   :  { %2630 = vrcp.f32 %v1744_v7 }
0x1433   :  { %2632 = vrcp.f32 %v1844_v9 }
0x143c   :  { %v2631_v29 = vpop.eup %2630 }
0x143d   :  { %v2633_v15 = vpop.eup %2632  ;;  %v1748_v19 = vmul.f32 %v2631_v29, %v1550_v33 }
0x143e   :  { %v1848_v6 = vmul.f32 %v2633_v15, %v1650_v47 }
0x1499   :  { %v1751_v42 = vpop.permute.xlu1 %1750 }
0x149a   :  { %v1753_v13 = vmul.f32 %v2631_v29, %v1751_v42 }
0x149c   :  { %1755 = vrot.lane.b32.xlu1 %v1753_v13, %s2642_s9 }
0x14a1   :  { %v1851_v10 = vpop.permute.xlu0 %1850 }
0x14a2   :  { %v1853_v18 = vmul.f32 %v2633_v15, %v1851_v10 }
0x14a4   :  { %1855 = vrot.lane.b32.xlu0 %v1853_v18, %s2642_s9 }
0x150e   :  { %v1756_v21 = vpop.permute.xlu1 %1755 }
0x150f   :  { %v1758_v16 = vadd.f32 %v1756_v21, %v1748_v19 }
0x1511   :  { %2634 = vtanh.f32 %v1758_v16 }
0x1516   :  { %v1856_v22 = vpop.permute.xlu0 %1855 }
0x1517   :  { %v1858_v20 = vadd.f32 %v1856_v22, %v1848_v6 }
0x1519   :  { %2636 = vtanh.f32 %v1858_v20 }
0x151b   :  { %v2635_v24 = vpop.eup %2634 }
0x151c   :  { %1761 = vrot.lane.b32.xlu1 %v2635_v24, %s2641_s2 }
0x1520   :  { %1663 = vrot.lane.b32.xlu1 %v1656_v53, %s2641_s2 }
0x1523   :  { %v2637_v3 = vpop.eup %2636 }
0x1524   :  { %1861 = vrot.lane.b32.xlu0 %v2637_v3, %s2641_s2  ;;  %1247 = vrot.lane.b32.xlu1 %v2985_v31, %s2641_s2  ;;  %v1886_v31 = vld [vmem:[%s3157_s5 + $0x18] sm:$0xff] }
0x1528   :  { %831 = vrot.lane.b32.xlu1 %v2915_v56, %s2641_s2  ;;  %v2491_v56 = vpack.c.bf16 %v1886_v31, %v1885_v32 }
0x152a   :  { %2492 = vmatprep.subr.bf16.mxu0 %v2491_v56 }
0x152b   :  { %2494 = vmatpush3.bf16.msra.mxu0 %v2491_v56 }
0x152c   :  { %414 = vrot.lane.b32.xlu1 %v2813_v11, %s2641_s2  ;;  %2496 = vmatprep.subr.bf16.mxu0 %v2495_v17  ;;  %v1889_v11 = vld [vmem:[%s3157_s5 + $0x30] sm:$0xff] }
0x152d   :  { %v2499_v28 = vpack.c.bf16 %v1890_v38, %v1889_v11 }
0x152f   :  { %2498 = vmatpush3.bf16.msra.mxu0 %v2495_v17 }
0x1530   :  { %2500 = vmatprep.subr.bf16.mxu0 %v2499_v28 }
0x1533   :  { %2502 = vmatpush3.bf16.msra.mxu0 %v2499_v28 }
0x158e   :  { %v1762_v37 = vpop.permute.xlu1 %1761 }
0x158f   :  { %v1764_v46 = vmul.f32 %v2631_v29, %v1762_v37 }
0x1592   :  { %v1664_v39 = vpop.permute.xlu1 %1663 }
0x1593   :  { %1666 = vst.msk [vmem:[#allocation3 + $0x8] sm:$0xff] %vm417_vm3, %v1664_v39 }
0x1596   :  { %v1862_v40 = vpop.permute.xlu0 %1861  ;;  %v1248_v41 = vpop.permute.xlu1 %1247 }
0x1597   :  { %v1864_v43 = vmul.f32 %v2633_v15, %v1862_v40  ;;  %1250 = vst.msk [vmem:[#allocation3 + $0x18] sm:$0xff] %vm417_vm3, %v1248_v41 }
0x1599   :  { %1871 = vrot.lane.b32.xlu0 %v1864_v43, %s2641_s2 }
0x159a   :  { %v832_v33 = vpop.permute.xlu1 %831 }
0x159b   :  { %834 = vst.msk [vmem:[#allocation3 + $0x28] sm:$0xff] %vm417_vm3, %v832_v33 }
0x159c   :  { %1453 = vst.msk [vmem:[#allocation3 + $0x28] sm:$0xff] %vm213_vm2, %v3021_v2 }
0x159d   :  { %1455 = vrot.lane.b32.xlu0 %v3017_v14, %s2641_s2 }
0x159e   :  { %v415_v44 = vpop.permute.xlu1 %414  ;;  %v1878_v49 = vld [vmem:[#allocation3 + $0x18] sm:$0xff] }
0x159f   :  { %418 = vst.msk [vmem:[#allocation3 + $0x38] sm:$0xff] %vm417_vm3, %v415_v44 }
0x15a1   :  { %1039 = vrot.lane.b32.xlu0 %v2953_v45, %s2641_s2  ;;  %v1876_v45 = vld [vmem:[#allocation3 + $0x8] sm:$0xff] }
0x15a5   :  { %623 = vrot.lane.b32.xlu0 %v2868_v63, %s2641_s2 }
0x15a9   :  { %1866 = vrot.lane.b32.xlu0 %v1764_v46, %s2642_s9 }
0x160b   :  { %v1872_v47 = vpop.permute.xlu0 %1871 }
0x160c   :  { %1874 = vst.msk [vmem:[#allocation3] sm:$0xff] %vm417_vm3, %v1872_v47 }
0x160f   :  { %v1456_v48 = vpop.permute.xlu0 %1455 }
0x1610   :  { %1458 = vst.msk [vmem:[#allocation3 + $0x10] sm:$0xff] %vm417_vm3, %v1456_v48 }
0x1613   :  { %v1040_v14 = vpop.permute.xlu0 %1039  ;;  %v1875_v2 = vld [vmem:[#allocation3] sm:$0xff] }
0x1614   :  { %1042 = vst.msk [vmem:[#allocation3 + $0x20] sm:$0xff] %vm417_vm3, %v1040_v14  ;;  %2375 = vmatprep.mubr.msk.f32.mxu0 %vm1898_vm4, %v1875_v2 }
0x1615   :  { %1245 = vst.msk [vmem:[#allocation3 + $0x20] sm:$0xff] %vm213_vm2, %v2989_v36  ;;  %2376 = vmatmul.mubr.msk.f32.vlgmr.msra.gmra.mrb[22].mxu0 %vm1898_vm4, %v1876_v45  ;;  %v1880_v36 = vld [vmem:[#allocation3 + $0x28] sm:$0xff] }
0x1617   :  { %v624_v63 = vpop.permute.xlu0 %623  ;;  %v1877_v26 = vld [vmem:[#allocation3 + $0x10] sm:$0xff] }
0x1618   :  { %626 = vst.msk [vmem:[#allocation3 + $0x30] sm:$0xff] %vm417_vm3, %v624_v63  ;;  %2378 = vmatprep.mubr.msk.f32.mxu0 %vm1898_vm4, %v1877_v26 }
0x1619   :  { %1661 = vst.msk [vmem:[#allocation3 + $0x30] sm:$0xff] %vm213_vm2, %v3048_v1  ;;  %2379 = vmatmul.mubr.msk.f32.gmra.mrb[24].mxu0 %vm1898_vm4, %v1878_v49  ;;  %v2078_v1 = vld [vmem:[%s3158_s6] ss:$0 sm:$0xff] }
0x161b   :  { %v1867_v50 = vpop.permute.xlu0 %1866 }
0x161c   :  { %1869 = vst.msk [vmem:[#allocation3 + $0x38] sm:$0xff] %vm213_vm2, %v1867_v50  ;;  %v1879_v52 = vld [vmem:[#allocation3 + $0x20] sm:$0xff] }
0x161d   :  { %2381 = vmatprep.mubr.msk.f32.mxu0 %vm1898_vm4, %v1879_v52 }
0x161e   :  { %2382 = vmatmul.mubr.msk.f32.gmra.mrb[26].mxu0 %vm1898_vm4, %v1880_v36 }
0x1620   :  { %v1881_v53 = vld [vmem:[#allocation3 + $0x30] sm:$0xff] }
0x1621   :  { %2384 = vmatprep.mubr.msk.f32.mxu0 %vm1898_vm4, %v1881_v53 }
0x1623   :  { %v1882_v51 = vld [vmem:[#allocation3 + $0x38] sm:$0xff] }
0x1624   :  { %2385 = vmatmul.mubr.msk.f32.gmra.mrb[28].mxu0 %vm1898_vm4, %v1882_v51 }
0x16e8   :  { %v2377_v55 = vpop.f32.mrb[22].mxu0 }
0x16e9   :  { %v1995_v54 = vadd.f32 %v2377_v55, %v2078_v1  ;;  %v1989_v57 = vpop.f32.mrb[23].mxu0 }
0x16ea   :  { %v1990_v58 = vadd.f32 %v2078_v1, %v1989_v57 }
0x16eb   :  { %2029 = vst [vmem:[%s3159_s7 + $0x8] sm:$0xff] %v1995_v54 }
0x16ec   :  { %2028 = vst [vmem:[%s3159_s7] sm:$0xff] %v1990_v58  ;;  %v2380_v59 = vpop.f32.mrb[24].mxu0 }
0x16ed   :  { %v2005_v5 = vadd.f32 %v2380_v59, %v2078_v1  ;;  %v1999_v60 = vpop.f32.mrb[25].mxu0 }
0x16ee   :  { %v2000_v61 = vadd.f32 %v2078_v1, %v1999_v60 }
0x16ef   :  { %2031 = vst [vmem:[%s3159_s7 + $0x18] sm:$0xff] %v2005_v5 }
0x16f0   :  { %2030 = vst [vmem:[%s3159_s7 + $0x10] sm:$0xff] %v2000_v61 }
0x16f1   :  { %v2383_v62 = vpop.f32.mrb[26].mxu0 }
0x16f2   :  { %v2015_v0 = vadd.f32 %v2383_v62, %v2078_v1  ;;  %v2009_v4 = vpop.f32.mrb[27].mxu0 }
0x16f3   :  { %v2010_v34 = vadd.f32 %v2078_v1, %v2009_v4 }
0x16f4   :  { %2033 = vst [vmem:[%s3159_s7 + $0x28] sm:$0xff] %v2015_v0 }
0x16f5   :  { %2032 = vst [vmem:[%s3159_s7 + $0x20] sm:$0xff] %v2010_v34 }
0x16f7   :  { %v2386_v35 = vpop.f32.mrb[28].mxu0 }
0x16f8   :  { %v2025_v7 = vadd.f32 %v2386_v35, %v2078_v1  ;;  %v2019_v8 = vpop.f32.mrb[29].mxu0 }
0x16f9   :  { %v2020_v9 = vadd.f32 %v2078_v1, %v2019_v8 }
0x16fa   :  { %2035 = vst [vmem:[%s3159_s7 + $0x38] sm:$0xff] %v2025_v7 }
0x16fb   :  { %2034 = vst [vmem:[%s3159_s7 + $0x30] sm:$0xff] %v2020_v9 }

</bundles_post_ra>
